<compile_context>
chip_gen: v5e
topology: v5e:2x2
jax: 0.10.0
libtpu: 0.0.40
codegen_flags: <defaults>
</compile_context>

<pallas_src>
import jax
import jax.numpy as jnp
import numpy as np
from jax.experimental import pallas as pl
from jax.experimental.pallas import tpu as pltpu


def lstm_classifier_kernel(x_ref, p_ref, wc_ref, bc_ref, wih_ref, whh_ref, b_ref,
                           h0_ref, c0_ref, wl_ref, bl_ref, out_ref, xg_sc):
    L_out, B, H4 = xg_sc.shape
    H = H4 // 4

    # ---- F.normalize(input): L2 norm over dim=1 (sequence axis), eps=1e-12 ----
    # 1/max(||x||, 1e-12) == rsqrt(max(sum(x^2), 1e-24)); rsqrt runs on the EUP slot.
    x = x_ref[...]                                              # (B, L, C)
    sumsq = jnp.sum(x * x, axis=1)                              # (B, C)
    inv = jax.lax.rsqrt(jnp.maximum(sumsq, 1e-24))              # (B, C)
    inv3 = jnp.tile(inv, (1, 3))                                # (B, 3C), col = k*C + c
    scale = jnp.concatenate([inv3] * L_out, axis=0)             # (L_out*B, 3C), row = t*B + b

    # ---- batched (all timesteps at once): conv-as-matmul + ReLU, then x->gates matmul ----
    p = p_ref[...] * scale                                      # (L_out*B, 3C)
    conv = jnp.dot(p, wc_ref[...], preferred_element_type=jnp.float32) + bc_ref[...]
    conv = jnp.maximum(conv, 0.0)                               # (L_out*B, 64)
    xg = jnp.dot(conv, wih_ref[...], preferred_element_type=jnp.float32) + b_ref[...]
    # Stage per-timestep gate pre-activations into a leading-indexed scratch (static fill).
    for t in range(L_out):
        xg_sc[t] = xg[t * B:(t + 1) * B, :]                     # (B, 4H)

    # ---- LSTM recurrence: only h @ W_hh^T on the serial path; h, c live in vregs ----
    def step(t, carry):
        h, c = carry
        gates = xg_sc[t] + jnp.dot(h, whh_ref[...], preferred_element_type=jnp.float32)
        i_g = jax.nn.sigmoid(gates[:, 0 * H:1 * H])
        f_g = jax.nn.sigmoid(gates[:, 1 * H:2 * H])
        g_g = jnp.tanh(gates[:, 2 * H:3 * H])
        o_g = jax.nn.sigmoid(gates[:, 3 * H:4 * H])
        c_new = f_g * c + i_g * g_g
        h_new = o_g * jnp.tanh(c_new)
        return h_new, c_new

    h, _ = jax.lax.fori_loop(0, L_out, step, (h0_ref[...], c0_ref[...]), unroll=True)

    # ---- final Linear ----
    out_ref[...] = (jnp.dot(h, wl_ref[...], preferred_element_type=jnp.float32)
                    + bl_ref[...])


def lstm_classifier_forward(x, params, h0, c0):
    """x: (B, L, C) float32. Returns (B, output_size)."""
    B, L, C = x.shape
    conv_w, conv_b, w_ih, w_hh, b_ih, b_hh, lin_w, lin_b = params
    CO = conv_w.shape[0]            # 64 conv output channels
    H = w_hh.shape[1]
    O = lin_w.shape[0]
    L_out = (L - 3) // 3 + 1

    # ---- glue: im2col of the UN-normalized input (layout plumbing only) ----
    # rows ordered t*B + b, cols ordered k*C + c
    xp = jnp.transpose(x, (0, 2, 1))[:, :, :L_out * 3]                 # (B, C, 3*L_out)
    patches = xp.reshape(B, C, L_out, 3)
    patches = jnp.transpose(patches, (2, 0, 3, 1)).reshape(L_out * B, 3 * C)

    # ---- glue: pre-transpose weights into (K, N) matmul layout ----
    wc = jnp.transpose(conv_w, (2, 1, 0)).reshape(3 * C, CO)           # wc[k*C+c, o] = conv_w[o, c, k]
    bc = conv_b.reshape(1, CO)
    wih = w_ih.T                                                       # (64, 4H)
    whh = w_hh.T                                                       # (H, 4H)
    b = (b_ih + b_hh).reshape(1, 4 * H)                                # fused bias, added once
    wl = lin_w.T                                                       # (H, O)
    bl = lin_b.reshape(1, O)

    full = lambda shape: pl.BlockSpec(shape, lambda i: (0,) * len(shape))

    # Everything is KB-scale, so all operands are fully VMEM-resident; single grid step.
    # TODO(synk): at realistic batch sizes, add a leading "parallel" batch-tile grid axis so
    # v7x's second TensorCore runs an independent recurrence on half the batch.
    return pl.pallas_call(
        lstm_classifier_kernel,
        out_shape=jax.ShapeDtypeStruct((B, O), jnp.float32),
        grid_spec=pltpu.PrefetchScalarGridSpec(
            num_scalar_prefetch=0,
            grid=(1,),
            in_specs=[
                full((B, L, C)),                                       # x (for in-kernel normalize)
                full((L_out * B, 3 * C)),                              # im2col patches, fully resident
                full((3 * C, CO)), full((1, CO)),                      # conv weight / bias
                full((CO, 4 * H)), full((H, 4 * H)), full((1, 4 * H)), # lstm weights / fused bias
                full((B, H)), full((B, H)),                            # h0, c0
                full((H, O)), full((1, O)),                            # linear
            ],
            out_specs=full((B, O)),
            scratch_shapes=[pltpu.VMEM((L_out, B, 4 * H), jnp.float32)],
        ),
        compiler_params=pltpu.CompilerParams(dimension_semantics=("arbitrary",)),
    )(x, patches, wc, bc, wih, whh, b, h0, c0, wl, bl)


def reference_forward(x, params, h0, c0):
    """Pure-JAX reference mirroring the PyTorch forward (mode='plain')."""
    conv_w, conv_b, w_ih, w_hh, b_ih, b_hh, lin_w, lin_b = params
    B, L, C = x.shape
    xn = x / jnp.maximum(jnp.sqrt(jnp.sum(x * x, axis=1, keepdims=True)), 1e-12)
    xp = jnp.transpose(xn, (0, 2, 1))                                  # (B, C, L)
    L_out = (L - 3) // 3 + 1
    pat = xp[:, :, :L_out * 3].reshape(B, C, L_out, 3)
    conv = jnp.einsum('bctk,ock->tbo', pat, conv_w) + conv_b           # (L_out, B, 64)
    conv = jnp.maximum(conv, 0.0)
    h, c = h0, c0
    for t in range(L_out):
        gates = conv[t] @ w_ih.T + b_ih + h @ w_hh.T + b_hh
        i, f, g, o = jnp.split(gates, 4, axis=1)
        c = jax.nn.sigmoid(f) * c + jax.nn.sigmoid(i) * jnp.tanh(g)
        h = jax.nn.sigmoid(o) * jnp.tanh(c)
    return h @ lin_w.T + lin_b


if __name__ == "__main__":
    # Small shapes consistent with the module
    B, L, C = 2, 24, 8          # batch, seq length, input_size
    H, O = 32, 4                # hidden_size, output_size
    epsilon = 0.1               # unused in mode='plain'

    key = jax.random.PRNGKey(0)
    ks = jax.random.split(key, 12)
    x = jax.random.normal(ks[0], (B, L, C), jnp.float32)

    conv_w = jax.random.normal(ks[1], (64, C, 3), jnp.float32) * 0.1
    conv_b = jax.random.normal(ks[2], (64,), jnp.float32) * 0.1
    w_ih = jax.random.normal(ks[3], (4 * H, 64), jnp.float32) * 0.1
    w_hh = jax.random.normal(ks[4], (4 * H, H), jnp.float32) * 0.1
    b_ih = jax.random.normal(ks[5], (4 * H,), jnp.float32) * 0.1
    b_hh = jax.random.normal(ks[6], (4 * H,), jnp.float32) * 0.1
    lin_w = jax.random.normal(ks[7], (O, H), jnp.float32) * 0.1
    lin_b = jax.random.normal(ks[8], (O,), jnp.float32) * 0.1
    # replaces torch.randn initial states (deterministic here)
    h0 = jax.random.normal(ks[9], (B, H), jnp.float32)
    c0 = jax.random.normal(ks[10], (B, H), jnp.float32)

    params = (conv_w, conv_b, w_ih, w_hh, b_ih, b_hh, lin_w, lin_b)

    out = lstm_classifier_forward(x, params, h0, c0)
    out = jax.block_until_ready(out)

    ref = jax.block_until_ready(reference_forward(x, params, h0, c0))
    assert out.shape == (B, O)
    np.testing.assert_allclose(np.asarray(out), np.asarray(ref), rtol=1e-4, atol=1e-4)

    # TODO(synk): modes 'AdvLSTM' and 'ProxLSTM' (require the undefined `pro` module and
    # adversarial perturbation r) are not implemented; only mode='plain' is covered.
    print("KERNEL_OK")
</pallas_src>

<mosaic_0001>
module attributes {stable_mosaic.version = 11 : i64} {
  func.func @lstm_classifier_kernel(%arg0: i32, %arg1: memref<2x24x8xf32, #tpu.memory_space<vmem>>, %arg2: memref<16x24xf32, #tpu.memory_space<vmem>>, %arg3: memref<24x64xf32, #tpu.memory_space<vmem>>, %arg4: memref<1x64xf32, #tpu.memory_space<vmem>>, %arg5: memref<64x128xf32, #tpu.memory_space<vmem>>, %arg6: memref<32x128xf32, #tpu.memory_space<vmem>>, %arg7: memref<1x128xf32, #tpu.memory_space<vmem>>, %arg8: memref<2x32xf32, #tpu.memory_space<vmem>>, %arg9: memref<2x32xf32, #tpu.memory_space<vmem>>, %arg10: memref<32x4xf32, #tpu.memory_space<vmem>>, %arg11: memref<1x4xf32, #tpu.memory_space<vmem>>, %arg12: memref<2x4xf32, #tpu.memory_space<vmem>>, %arg13: memref<8x2x128xf32, #tpu.memory_space<vmem>>) attributes {dimension_semantics = [#tpu.dimension_semantics<arbitrary>], iteration_bounds = array<i64: 1>, scalar_prefetch = 0 : i64, scratch_operands = 1 : i64, tpu.core_type = #tpu.core_type<tc>, window_params = [{pipeline_mode = #tpu.pipeline_mode<synchronous>, transform_indices = @transform_0, window_bounds = array<i64: 2, 24, 8>}, {pipeline_mode = #tpu.pipeline_mode<synchronous>, transform_indices = @transform_1, window_bounds = array<i64: 16, 24>}, {pipeline_mode = #tpu.pipeline_mode<synchronous>, transform_indices = @transform_2, window_bounds = array<i64: 24, 64>}, {pipeline_mode = #tpu.pipeline_mode<synchronous>, transform_indices = @transform_3, window_bounds = array<i64: 1, 64>}, {pipeline_mode = #tpu.pipeline_mode<synchronous>, transform_indices = @transform_4, window_bounds = array<i64: 64, 128>}, {pipeline_mode = #tpu.pipeline_mode<synchronous>, transform_indices = @transform_5, window_bounds = array<i64: 32, 128>}, {pipeline_mode = #tpu.pipeline_mode<synchronous>, transform_indices = @transform_6, window_bounds = array<i64: 1, 128>}, {pipeline_mode = #tpu.pipeline_mode<synchronous>, transform_indices = @transform_7, window_bounds = array<i64: 2, 32>}, {pipeline_mode = #tpu.pipeline_mode<synchronous>, transform_indices = @transform_8, window_bounds = array<i64: 2, 32>}, {pipeline_mode = #tpu.pipeline_mode<synchronous>, transform_indices = @transform_9, window_bounds = array<i64: 32, 4>}, {pipeline_mode = #tpu.pipeline_mode<synchronous>, transform_indices = @transform_10, window_bounds = array<i64: 1, 4>}, {pipeline_mode = #tpu.pipeline_mode<synchronous>, transform_indices = @transform_11, window_bounds = array<i64: 2, 4>}]} {
    %c0 = arith.constant 0 : index
    %c0_0 = arith.constant 0 : index
    %c0_1 = arith.constant 0 : index
    %0 = vector.load %arg1[%c0, %c0_0, %c0_1] : memref<2x24x8xf32, #tpu.memory_space<vmem>>, vector<2x24x8xf32>
    %1 = arith.mulf %0, %0 : vector<2x24x8xf32>
    %cst = arith.constant dense<0.000000e+00> : vector<2x8xf32>
    %2 = vector.multi_reduction <add>, %1, %cst [1] : vector<2x24x8xf32> to vector<2x8xf32>
    %cst_2 = arith.constant 1.000000e-24 : f32
    %3 = vector.broadcast %cst_2 : f32 to vector<2x8xf32>
    %4 = arith.maximumf %2, %3 : vector<2x8xf32>
    %5 = math.rsqrt %4 : vector<2x8xf32>
    %6 = tpu.concatenate %5, %5, %5 in 1 : vector<2x8xf32>, vector<2x8xf32>, vector<2x8xf32> -> vector<2x24xf32>
    %7 = tpu.concatenate %6, %6, %6, %6, %6, %6, %6, %6 in 0 : vector<2x24xf32>, vector<2x24xf32>, vector<2x24xf32>, vector<2x24xf32>, vector<2x24xf32>, vector<2x24xf32>, vector<2x24xf32>, vector<2x24xf32> -> vector<16x24xf32>
    %c0_3 = arith.constant 0 : index
    %c0_4 = arith.constant 0 : index
    %8 = vector.load %arg2[%c0_3, %c0_4] : memref<16x24xf32, #tpu.memory_space<vmem>>, vector<16x24xf32>
    %9 = arith.mulf %8, %7 : vector<16x24xf32>
    %c0_5 = arith.constant 0 : index
    %c0_6 = arith.constant 0 : index
    %10 = vector.load %arg3[%c0_5, %c0_6] : memref<24x64xf32, #tpu.memory_space<vmem>>, vector<24x64xf32>
    %cst_7 = arith.constant dense<0.000000e+00> : vector<16x64xf32>
    %11 = tpu.matmul %9, %10, %cst_7 {dimension_numbers = #tpu.dot_dimension_numbers<[1], [0], [0], [1], [0, 0, 1, 1], [], []>} : vector<16x24xf32>, vector<24x64xf32>, vector<16x64xf32> -> vector<16x64xf32>
    %c0_8 = arith.constant 0 : index
    %c0_9 = arith.constant 0 : index
    %12 = vector.load %arg4[%c0_8, %c0_9] : memref<1x64xf32, #tpu.memory_space<vmem>>, vector<1x64xf32>
    %13 = vector.broadcast %12 : vector<1x64xf32> to vector<16x64xf32>
    %14 = arith.addf %11, %13 : vector<16x64xf32>
    %cst_10 = arith.constant 0.000000e+00 : f32
    %15 = vector.broadcast %cst_10 : f32 to vector<16x64xf32>
    %16 = arith.maximumf %14, %15 : vector<16x64xf32>
    %c0_11 = arith.constant 0 : index
    %c0_12 = arith.constant 0 : index
    %17 = vector.load %arg5[%c0_11, %c0_12] : memref<64x128xf32, #tpu.memory_space<vmem>>, vector<64x128xf32>
    %cst_13 = arith.constant dense<0.000000e+00> : vector<16x128xf32>
    %18 = tpu.matmul %16, %17, %cst_13 {dimension_numbers = #tpu.dot_dimension_numbers<[1], [0], [0], [1], [0, 0, 1, 1], [], []>} : vector<16x64xf32>, vector<64x128xf32>, vector<16x128xf32> -> vector<16x128xf32>
    %c0_14 = arith.constant 0 : index
    %c0_15 = arith.constant 0 : index
    %19 = vector.load %arg7[%c0_14, %c0_15] : memref<1x128xf32, #tpu.memory_space<vmem>>, vector<1x128xf32>
    %20 = vector.broadcast %19 : vector<1x128xf32> to vector<16x128xf32>
    %21 = arith.addf %18, %20 : vector<16x128xf32>
    %22 = vector.extract_strided_slice %21 {offsets = [0, 0], sizes = [2, 128], strides = [1, 1]} : vector<16x128xf32> to vector<2x128xf32>
    %c0_16 = arith.constant 0 : index
    %c0_17 = arith.constant 0 : index
    %c0_18 = arith.constant 0 : index
    %23 = vector.load %arg13[%c0_16, %c0_17, %c0_18] : memref<8x2x128xf32, #tpu.memory_space<vmem>>, vector<1x2x128xf32>
    %24 = vector.shape_cast %23 : vector<1x2x128xf32> to vector<2x128xf32>
    %25 = vector.shape_cast %22 : vector<2x128xf32> to vector<1x2x128xf32>
    tpu.vector_store %arg13[%c0_16, %c0_17, %c0_18], %25 {strides = array<i32>} : memref<8x2x128xf32, #tpu.memory_space<vmem>>, vector<1x2x128xf32>,
    %26 = vector.extract_strided_slice %21 {offsets = [2, 0], sizes = [2, 128], strides = [1, 1]} : vector<16x128xf32> to vector<2x128xf32>
    %c1 = arith.constant 1 : index
    %c0_19 = arith.constant 0 : index
    %c0_20 = arith.constant 0 : index
    %27 = vector.load %arg13[%c1, %c0_19, %c0_20] : memref<8x2x128xf32, #tpu.memory_space<vmem>>, vector<1x2x128xf32>
    %28 = vector.shape_cast %27 : vector<1x2x128xf32> to vector<2x128xf32>
    %29 = vector.shape_cast %26 : vector<2x128xf32> to vector<1x2x128xf32>
    tpu.vector_store %arg13[%c1, %c0_19, %c0_20], %29 {strides = array<i32>} : memref<8x2x128xf32, #tpu.memory_space<vmem>>, vector<1x2x128xf32>,
    %30 = vector.extract_strided_slice %21 {offsets = [4, 0], sizes = [2, 128], strides = [1, 1]} : vector<16x128xf32> to vector<2x128xf32>
    %c2 = arith.constant 2 : index
    %c0_21 = arith.constant 0 : index
    %c0_22 = arith.constant 0 : index
    %31 = vector.load %arg13[%c2, %c0_21, %c0_22] : memref<8x2x128xf32, #tpu.memory_space<vmem>>, vector<1x2x128xf32>
    %32 = vector.shape_cast %31 : vector<1x2x128xf32> to vector<2x128xf32>
    %33 = vector.shape_cast %30 : vector<2x128xf32> to vector<1x2x128xf32>
    tpu.vector_store %arg13[%c2, %c0_21, %c0_22], %33 {strides = array<i32>} : memref<8x2x128xf32, #tpu.memory_space<vmem>>, vector<1x2x128xf32>,
    %34 = vector.extract_strided_slice %21 {offsets = [6, 0], sizes = [2, 128], strides = [1, 1]} : vector<16x128xf32> to vector<2x128xf32>
    %c3 = arith.constant 3 : index
    %c0_23 = arith.constant 0 : index
    %c0_24 = arith.constant 0 : index
    %35 = vector.load %arg13[%c3, %c0_23, %c0_24] : memref<8x2x128xf32, #tpu.memory_space<vmem>>, vector<1x2x128xf32>
    %36 = vector.shape_cast %35 : vector<1x2x128xf32> to vector<2x128xf32>
    %37 = vector.shape_cast %34 : vector<2x128xf32> to vector<1x2x128xf32>
    tpu.vector_store %arg13[%c3, %c0_23, %c0_24], %37 {strides = array<i32>} : memref<8x2x128xf32, #tpu.memory_space<vmem>>, vector<1x2x128xf32>,
    %38 = vector.extract_strided_slice %21 {offsets = [8, 0], sizes = [2, 128], strides = [1, 1]} : vector<16x128xf32> to vector<2x128xf32>
    %c4 = arith.constant 4 : index
    %c0_25 = arith.constant 0 : index
    %c0_26 = arith.constant 0 : index
    %39 = vector.load %arg13[%c4, %c0_25, %c0_26] : memref<8x2x128xf32, #tpu.memory_space<vmem>>, vector<1x2x128xf32>
    %40 = vector.shape_cast %39 : vector<1x2x128xf32> to vector<2x128xf32>
    %41 = vector.shape_cast %38 : vector<2x128xf32> to vector<1x2x128xf32>
    tpu.vector_store %arg13[%c4, %c0_25, %c0_26], %41 {strides = array<i32>} : memref<8x2x128xf32, #tpu.memory_space<vmem>>, vector<1x2x128xf32>,
    %42 = vector.extract_strided_slice %21 {offsets = [10, 0], sizes = [2, 128], strides = [1, 1]} : vector<16x128xf32> to vector<2x128xf32>
    %c5 = arith.constant 5 : index
    %c0_27 = arith.constant 0 : index
    %c0_28 = arith.constant 0 : index
    %43 = vector.load %arg13[%c5, %c0_27, %c0_28] : memref<8x2x128xf32, #tpu.memory_space<vmem>>, vector<1x2x128xf32>
    %44 = vector.shape_cast %43 : vector<1x2x128xf32> to vector<2x128xf32>
    %45 = vector.shape_cast %42 : vector<2x128xf32> to vector<1x2x128xf32>
    tpu.vector_store %arg13[%c5, %c0_27, %c0_28], %45 {strides = array<i32>} : memref<8x2x128xf32, #tpu.memory_space<vmem>>, vector<1x2x128xf32>,
    %46 = vector.extract_strided_slice %21 {offsets = [12, 0], sizes = [2, 128], strides = [1, 1]} : vector<16x128xf32> to vector<2x128xf32>
    %c6 = arith.constant 6 : index
    %c0_29 = arith.constant 0 : index
    %c0_30 = arith.constant 0 : index
    %47 = vector.load %arg13[%c6, %c0_29, %c0_30] : memref<8x2x128xf32, #tpu.memory_space<vmem>>, vector<1x2x128xf32>
    %48 = vector.shape_cast %47 : vector<1x2x128xf32> to vector<2x128xf32>
    %49 = vector.shape_cast %46 : vector<2x128xf32> to vector<1x2x128xf32>
    tpu.vector_store %arg13[%c6, %c0_29, %c0_30], %49 {strides = array<i32>} : memref<8x2x128xf32, #tpu.memory_space<vmem>>, vector<1x2x128xf32>,
    %50 = vector.extract_strided_slice %21 {offsets = [14, 0], sizes = [2, 128], strides = [1, 1]} : vector<16x128xf32> to vector<2x128xf32>
    %c7 = arith.constant 7 : index
    %c0_31 = arith.constant 0 : index
    %c0_32 = arith.constant 0 : index
    %51 = vector.load %arg13[%c7, %c0_31, %c0_32] : memref<8x2x128xf32, #tpu.memory_space<vmem>>, vector<1x2x128xf32>
    %52 = vector.shape_cast %51 : vector<1x2x128xf32> to vector<2x128xf32>
    %53 = vector.shape_cast %50 : vector<2x128xf32> to vector<1x2x128xf32>
    tpu.vector_store %arg13[%c7, %c0_31, %c0_32], %53 {strides = array<i32>} : memref<8x2x128xf32, #tpu.memory_space<vmem>>, vector<1x2x128xf32>,
    %c0_33 = arith.constant 0 : index
    %c0_34 = arith.constant 0 : index
    %54 = vector.load %arg8[%c0_33, %c0_34] : memref<2x32xf32, #tpu.memory_space<vmem>>, vector<2x32xf32>
    %c0_35 = arith.constant 0 : index
    %c0_36 = arith.constant 0 : index
    %55 = vector.load %arg9[%c0_35, %c0_36] : memref<2x32xf32, #tpu.memory_space<vmem>>, vector<2x32xf32>
    %c0_i32 = arith.constant 0 : i32
    %56 = arith.index_cast %c0_i32 : i32 to index
    %c0_37 = arith.constant 0 : index
    %c0_38 = arith.constant 0 : index
    %57 = vector.load %arg13[%56, %c0_37, %c0_38] : memref<8x2x128xf32, #tpu.memory_space<vmem>>, vector<1x2x128xf32>
    %58 = vector.shape_cast %57 : vector<1x2x128xf32> to vector<2x128xf32>
    %c0_39 = arith.constant 0 : index
    %c0_40 = arith.constant 0 : index
    %59 = vector.load %arg6[%c0_39, %c0_40] : memref<32x128xf32, #tpu.memory_space<vmem>>, vector<32x128xf32>
    %cst_41 = arith.constant dense<0.000000e+00> : vector<2x128xf32>
    %60 = tpu.matmul %54, %59, %cst_41 {dimension_numbers = #tpu.dot_dimension_numbers<[1], [0], [0], [1], [0, 0, 1, 1], [], []>} : vector<2x32xf32>, vector<32x128xf32>, vector<2x128xf32> -> vector<2x128xf32>
    %61 = arith.addf %58, %60 : vector<2x128xf32>
    %62 = vector.extract_strided_slice %61 {offsets = [0, 0], sizes = [2, 32], strides = [1, 1]} : vector<2x128xf32> to vector<2x32xf32>
    %63 = arith.negf %62 : vector<2x32xf32>
    %64 = math.exp %63 : vector<2x32xf32>
    %cst_42 = arith.constant 1.000000e+00 : f32
    %65 = vector.broadcast %cst_42 : f32 to vector<2x32xf32>
    %66 = arith.addf %65, %64 : vector<2x32xf32>
    %67 = arith.divf %65, %66 : vector<2x32xf32>
    %68 = vector.extract_strided_slice %61 {offsets = [0, 32], sizes = [2, 32], strides = [1, 1]} : vector<2x128xf32> to vector<2x32xf32>
    %69 = arith.negf %68 : vector<2x32xf32>
    %70 = math.exp %69 : vector<2x32xf32>
    %cst_43 = arith.constant 1.000000e+00 : f32
    %71 = vector.broadcast %cst_43 : f32 to vector<2x32xf32>
    %72 = arith.addf %71, %70 : vector<2x32xf32>
    %73 = arith.divf %71, %72 : vector<2x32xf32>
    %74 = vector.extract_strided_slice %61 {offsets = [0, 64], sizes = [2, 32], strides = [1, 1]} : vector<2x128xf32> to vector<2x32xf32>
    %75 = math.tanh %74 : vector<2x32xf32>
    %76 = vector.extract_strided_slice %61 {offsets = [0, 96], sizes = [2, 32], strides = [1, 1]} : vector<2x128xf32> to vector<2x32xf32>
    %77 = arith.negf %76 : vector<2x32xf32>
    %78 = math.exp %77 : vector<2x32xf32>
    %cst_44 = arith.constant 1.000000e+00 : f32
    %79 = vector.broadcast %cst_44 : f32 to vector<2x32xf32>
    %80 = arith.addf %79, %78 : vector<2x32xf32>
    %81 = arith.divf %79, %80 : vector<2x32xf32>
    %82 = arith.mulf %73, %55 : vector<2x32xf32>
    %83 = arith.mulf %67, %75 : vector<2x32xf32>
    %84 = arith.addf %82, %83 : vector<2x32xf32>
    %85 = math.tanh %84 : vector<2x32xf32>
    %86 = arith.mulf %81, %85 : vector<2x32xf32>
    %c1_i32 = arith.constant 1 : i32
    %87 = arith.index_cast %c1_i32 : i32 to index
    %c0_45 = arith.constant 0 : index
    %c0_46 = arith.constant 0 : index
    %88 = vector.load %arg13[%87, %c0_45, %c0_46] : memref<8x2x128xf32, #tpu.memory_space<vmem>>, vector<1x2x128xf32>
    %89 = vector.shape_cast %88 : vector<1x2x128xf32> to vector<2x128xf32>
    %c0_47 = arith.constant 0 : index
    %c0_48 = arith.constant 0 : index
    %90 = vector.load %arg6[%c0_47, %c0_48] : memref<32x128xf32, #tpu.memory_space<vmem>>, vector<32x128xf32>
    %cst_49 = arith.constant dense<0.000000e+00> : vector<2x128xf32>
    %91 = tpu.matmul %86, %90, %cst_49 {dimension_numbers = #tpu.dot_dimension_numbers<[1], [0], [0], [1], [0, 0, 1, 1], [], []>} : vector<2x32xf32>, vector<32x128xf32>, vector<2x128xf32> -> vector<2x128xf32>
    %92 = arith.addf %89, %91 : vector<2x128xf32>
    %93 = vector.extract_strided_slice %92 {offsets = [0, 0], sizes = [2, 32], strides = [1, 1]} : vector<2x128xf32> to vector<2x32xf32>
    %94 = arith.negf %93 : vector<2x32xf32>
    %95 = math.exp %94 : vector<2x32xf32>
    %cst_50 = arith.constant 1.000000e+00 : f32
    %96 = vector.broadcast %cst_50 : f32 to vector<2x32xf32>
    %97 = arith.addf %96, %95 : vector<2x32xf32>
    %98 = arith.divf %96, %97 : vector<2x32xf32>
    %99 = vector.extract_strided_slice %92 {offsets = [0, 32], sizes = [2, 32], strides = [1, 1]} : vector<2x128xf32> to vector<2x32xf32>
    %100 = arith.negf %99 : vector<2x32xf32>
    %101 = math.exp %100 : vector<2x32xf32>
    %cst_51 = arith.constant 1.000000e+00 : f32
    %102 = vector.broadcast %cst_51 : f32 to vector<2x32xf32>
    %103 = arith.addf %102, %101 : vector<2x32xf32>
    %104 = arith.divf %102, %103 : vector<2x32xf32>
    %105 = vector.extract_strided_slice %92 {offsets = [0, 64], sizes = [2, 32], strides = [1, 1]} : vector<2x128xf32> to vector<2x32xf32>
    %106 = math.tanh %105 : vector<2x32xf32>
    %107 = vector.extract_strided_slice %92 {offsets = [0, 96], sizes = [2, 32], strides = [1, 1]} : vector<2x128xf32> to vector<2x32xf32>
    %108 = arith.negf %107 : vector<2x32xf32>
    %109 = math.exp %108 : vector<2x32xf32>
    %cst_52 = arith.constant 1.000000e+00 : f32
    %110 = vector.broadcast %cst_52 : f32 to vector<2x32xf32>
    %111 = arith.addf %110, %109 : vector<2x32xf32>
    %112 = arith.divf %110, %111 : vector<2x32xf32>
    %113 = arith.mulf %104, %84 : vector<2x32xf32>
    %114 = arith.mulf %98, %106 : vector<2x32xf32>
    %115 = arith.addf %113, %114 : vector<2x32xf32>
    %116 = math.tanh %115 : vector<2x32xf32>
    %117 = arith.mulf %112, %116 : vector<2x32xf32>
    %c2_i32 = arith.constant 2 : i32
    %118 = arith.index_cast %c2_i32 : i32 to index
    %c0_53 = arith.constant 0 : index
    %c0_54 = arith.constant 0 : index
    %119 = vector.load %arg13[%118, %c0_53, %c0_54] : memref<8x2x128xf32, #tpu.memory_space<vmem>>, vector<1x2x128xf32>
    %120 = vector.shape_cast %119 : vector<1x2x128xf32> to vector<2x128xf32>
    %c0_55 = arith.constant 0 : index
    %c0_56 = arith.constant 0 : index
    %121 = vector.load %arg6[%c0_55, %c0_56] : memref<32x128xf32, #tpu.memory_space<vmem>>, vector<32x128xf32>
    %cst_57 = arith.constant dense<0.000000e+00> : vector<2x128xf32>
    %122 = tpu.matmul %117, %121, %cst_57 {dimension_numbers = #tpu.dot_dimension_numbers<[1], [0], [0], [1], [0, 0, 1, 1], [], []>} : vector<2x32xf32>, vector<32x128xf32>, vector<2x128xf32> -> vector<2x128xf32>
    %123 = arith.addf %120, %122 : vector<2x128xf32>
    %124 = vector.extract_strided_slice %123 {offsets = [0, 0], sizes = [2, 32], strides = [1, 1]} : vector<2x128xf32> to vector<2x32xf32>
    %125 = arith.negf %124 : vector<2x32xf32>
    %126 = math.exp %125 : vector<2x32xf32>
    %cst_58 = arith.constant 1.000000e+00 : f32
    %127 = vector.broadcast %cst_58 : f32 to vector<2x32xf32>
    %128 = arith.addf %127, %126 : vector<2x32xf32>
    %129 = arith.divf %127, %128 : vector<2x32xf32>
    %130 = vector.extract_strided_slice %123 {offsets = [0, 32], sizes = [2, 32], strides = [1, 1]} : vector<2x128xf32> to vector<2x32xf32>
    %131 = arith.negf %130 : vector<2x32xf32>
    %132 = math.exp %131 : vector<2x32xf32>
    %cst_59 = arith.constant 1.000000e+00 : f32
    %133 = vector.broadcast %cst_59 : f32 to vector<2x32xf32>
    %134 = arith.addf %133, %132 : vector<2x32xf32>
    %135 = arith.divf %133, %134 : vector<2x32xf32>
    %136 = vector.extract_strided_slice %123 {offsets = [0, 64], sizes = [2, 32], strides = [1, 1]} : vector<2x128xf32> to vector<2x32xf32>
    %137 = math.tanh %136 : vector<2x32xf32>
    %138 = vector.extract_strided_slice %123 {offsets = [0, 96], sizes = [2, 32], strides = [1, 1]} : vector<2x128xf32> to vector<2x32xf32>
    %139 = arith.negf %138 : vector<2x32xf32>
    %140 = math.exp %139 : vector<2x32xf32>
    %cst_60 = arith.constant 1.000000e+00 : f32
    %141 = vector.broadcast %cst_60 : f32 to vector<2x32xf32>
    %142 = arith.addf %141, %140 : vector<2x32xf32>
    %143 = arith.divf %141, %142 : vector<2x32xf32>
    %144 = arith.mulf %135, %115 : vector<2x32xf32>
    %145 = arith.mulf %129, %137 : vector<2x32xf32>
    %146 = arith.addf %144, %145 : vector<2x32xf32>
    %147 = math.tanh %146 : vector<2x32xf32>
    %148 = arith.mulf %143, %147 : vector<2x32xf32>
    %c3_i32 = arith.constant 3 : i32
    %149 = arith.index_cast %c3_i32 : i32 to index
    %c0_61 = arith.constant 0 : index
    %c0_62 = arith.constant 0 : index
    %150 = vector.load %arg13[%149, %c0_61, %c0_62] : memref<8x2x128xf32, #tpu.memory_space<vmem>>, vector<1x2x128xf32>
    %151 = vector.shape_cast %150 : vector<1x2x128xf32> to vector<2x128xf32>
    %c0_63 = arith.constant 0 : index
    %c0_64 = arith.constant 0 : index
    %152 = vector.load %arg6[%c0_63, %c0_64] : memref<32x128xf32, #tpu.memory_space<vmem>>, vector<32x128xf32>
    %cst_65 = arith.constant dense<0.000000e+00> : vector<2x128xf32>
    %153 = tpu.matmul %148, %152, %cst_65 {dimension_numbers = #tpu.dot_dimension_numbers<[1], [0], [0], [1], [0, 0, 1, 1], [], []>} : vector<2x32xf32>, vector<32x128xf32>, vector<2x128xf32> -> vector<2x128xf32>
    %154 = arith.addf %151, %153 : vector<2x128xf32>
    %155 = vector.extract_strided_slice %154 {offsets = [0, 0], sizes = [2, 32], strides = [1, 1]} : vector<2x128xf32> to vector<2x32xf32>
    %156 = arith.negf %155 : vector<2x32xf32>
    %157 = math.exp %156 : vector<2x32xf32>
    %cst_66 = arith.constant 1.000000e+00 : f32
    %158 = vector.broadcast %cst_66 : f32 to vector<2x32xf32>
    %159 = arith.addf %158, %157 : vector<2x32xf32>
    %160 = arith.divf %158, %159 : vector<2x32xf32>
    %161 = vector.extract_strided_slice %154 {offsets = [0, 32], sizes = [2, 32], strides = [1, 1]} : vector<2x128xf32> to vector<2x32xf32>
    %162 = arith.negf %161 : vector<2x32xf32>
    %163 = math.exp %162 : vector<2x32xf32>
    %cst_67 = arith.constant 1.000000e+00 : f32
    %164 = vector.broadcast %cst_67 : f32 to vector<2x32xf32>
    %165 = arith.addf %164, %163 : vector<2x32xf32>
    %166 = arith.divf %164, %165 : vector<2x32xf32>
    %167 = vector.extract_strided_slice %154 {offsets = [0, 64], sizes = [2, 32], strides = [1, 1]} : vector<2x128xf32> to vector<2x32xf32>
    %168 = math.tanh %167 : vector<2x32xf32>
    %169 = vector.extract_strided_slice %154 {offsets = [0, 96], sizes = [2, 32], strides = [1, 1]} : vector<2x128xf32> to vector<2x32xf32>
    %170 = arith.negf %169 : vector<2x32xf32>
    %171 = math.exp %170 : vector<2x32xf32>
    %cst_68 = arith.constant 1.000000e+00 : f32
    %172 = vector.broadcast %cst_68 : f32 to vector<2x32xf32>
    %173 = arith.addf %172, %171 : vector<2x32xf32>
    %174 = arith.divf %172, %173 : vector<2x32xf32>
    %175 = arith.mulf %166, %146 : vector<2x32xf32>
    %176 = arith.mulf %160, %168 : vector<2x32xf32>
    %177 = arith.addf %175, %176 : vector<2x32xf32>
    %178 = math.tanh %177 : vector<2x32xf32>
    %179 = arith.mulf %174, %178 : vector<2x32xf32>
    %c4_i32 = arith.constant 4 : i32
    %180 = arith.index_cast %c4_i32 : i32 to index
    %c0_69 = arith.constant 0 : index
    %c0_70 = arith.constant 0 : index
    %181 = vector.load %arg13[%180, %c0_69, %c0_70] : memref<8x2x128xf32, #tpu.memory_space<vmem>>, vector<1x2x128xf32>
    %182 = vector.shape_cast %181 : vector<1x2x128xf32> to vector<2x128xf32>
    %c0_71 = arith.constant 0 : index
    %c0_72 = arith.constant 0 : index
    %183 = vector.load %arg6[%c0_71, %c0_72] : memref<32x128xf32, #tpu.memory_space<vmem>>, vector<32x128xf32>
    %cst_73 = arith.constant dense<0.000000e+00> : vector<2x128xf32>
    %184 = tpu.matmul %179, %183, %cst_73 {dimension_numbers = #tpu.dot_dimension_numbers<[1], [0], [0], [1], [0, 0, 1, 1], [], []>} : vector<2x32xf32>, vector<32x128xf32>, vector<2x128xf32> -> vector<2x128xf32>
    %185 = arith.addf %182, %184 : vector<2x128xf32>
    %186 = vector.extract_strided_slice %185 {offsets = [0, 0], sizes = [2, 32], strides = [1, 1]} : vector<2x128xf32> to vector<2x32xf32>
    %187 = arith.negf %186 : vector<2x32xf32>
    %188 = math.exp %187 : vector<2x32xf32>
    %cst_74 = arith.constant 1.000000e+00 : f32
    %189 = vector.broadcast %cst_74 : f32 to vector<2x32xf32>
    %190 = arith.addf %189, %188 : vector<2x32xf32>
    %191 = arith.divf %189, %190 : vector<2x32xf32>
    %192 = vector.extract_strided_slice %185 {offsets = [0, 32], sizes = [2, 32], strides = [1, 1]} : vector<2x128xf32> to vector<2x32xf32>
    %193 = arith.negf %192 : vector<2x32xf32>
    %194 = math.exp %193 : vector<2x32xf32>
    %cst_75 = arith.constant 1.000000e+00 : f32
    %195 = vector.broadcast %cst_75 : f32 to vector<2x32xf32>
    %196 = arith.addf %195, %194 : vector<2x32xf32>
    %197 = arith.divf %195, %196 : vector<2x32xf32>
    %198 = vector.extract_strided_slice %185 {offsets = [0, 64], sizes = [2, 32], strides = [1, 1]} : vector<2x128xf32> to vector<2x32xf32>
    %199 = math.tanh %198 : vector<2x32xf32>
    %200 = vector.extract_strided_slice %185 {offsets = [0, 96], sizes = [2, 32], strides = [1, 1]} : vector<2x128xf32> to vector<2x32xf32>
    %201 = arith.negf %200 : vector<2x32xf32>
    %202 = math.exp %201 : vector<2x32xf32>
    %cst_76 = arith.constant 1.000000e+00 : f32
    %203 = vector.broadcast %cst_76 : f32 to vector<2x32xf32>
    %204 = arith.addf %203, %202 : vector<2x32xf32>
    %205 = arith.divf %203, %204 : vector<2x32xf32>
    %206 = arith.mulf %197, %177 : vector<2x32xf32>
    %207 = arith.mulf %191, %199 : vector<2x32xf32>
    %208 = arith.addf %206, %207 : vector<2x32xf32>
    %209 = math.tanh %208 : vector<2x32xf32>
    %210 = arith.mulf %205, %209 : vector<2x32xf32>
    %c5_i32 = arith.constant 5 : i32
    %211 = arith.index_cast %c5_i32 : i32 to index
    %c0_77 = arith.constant 0 : index
    %c0_78 = arith.constant 0 : index
    %212 = vector.load %arg13[%211, %c0_77, %c0_78] : memref<8x2x128xf32, #tpu.memory_space<vmem>>, vector<1x2x128xf32>
    %213 = vector.shape_cast %212 : vector<1x2x128xf32> to vector<2x128xf32>
    %c0_79 = arith.constant 0 : index
    %c0_80 = arith.constant 0 : index
    %214 = vector.load %arg6[%c0_79, %c0_80] : memref<32x128xf32, #tpu.memory_space<vmem>>, vector<32x128xf32>
    %cst_81 = arith.constant dense<0.000000e+00> : vector<2x128xf32>
    %215 = tpu.matmul %210, %214, %cst_81 {dimension_numbers = #tpu.dot_dimension_numbers<[1], [0], [0], [1], [0, 0, 1, 1], [], []>} : vector<2x32xf32>, vector<32x128xf32>, vector<2x128xf32> -> vector<2x128xf32>
    %216 = arith.addf %213, %215 : vector<2x128xf32>
    %217 = vector.extract_strided_slice %216 {offsets = [0, 0], sizes = [2, 32], strides = [1, 1]} : vector<2x128xf32> to vector<2x32xf32>
    %218 = arith.negf %217 : vector<2x32xf32>
    %219 = math.exp %218 : vector<2x32xf32>
    %cst_82 = arith.constant 1.000000e+00 : f32
    %220 = vector.broadcast %cst_82 : f32 to vector<2x32xf32>
    %221 = arith.addf %220, %219 : vector<2x32xf32>
    %222 = arith.divf %220, %221 : vector<2x32xf32>
    %223 = vector.extract_strided_slice %216 {offsets = [0, 32], sizes = [2, 32], strides = [1, 1]} : vector<2x128xf32> to vector<2x32xf32>
    %224 = arith.negf %223 : vector<2x32xf32>
    %225 = math.exp %224 : vector<2x32xf32>
    %cst_83 = arith.constant 1.000000e+00 : f32
    %226 = vector.broadcast %cst_83 : f32 to vector<2x32xf32>
    %227 = arith.addf %226, %225 : vector<2x32xf32>
    %228 = arith.divf %226, %227 : vector<2x32xf32>
    %229 = vector.extract_strided_slice %216 {offsets = [0, 64], sizes = [2, 32], strides = [1, 1]} : vector<2x128xf32> to vector<2x32xf32>
    %230 = math.tanh %229 : vector<2x32xf32>
    %231 = vector.extract_strided_slice %216 {offsets = [0, 96], sizes = [2, 32], strides = [1, 1]} : vector<2x128xf32> to vector<2x32xf32>
    %232 = arith.negf %231 : vector<2x32xf32>
    %233 = math.exp %232 : vector<2x32xf32>
    %cst_84 = arith.constant 1.000000e+00 : f32
    %234 = vector.broadcast %cst_84 : f32 to vector<2x32xf32>
    %235 = arith.addf %234, %233 : vector<2x32xf32>
    %236 = arith.divf %234, %235 : vector<2x32xf32>
    %237 = arith.mulf %228, %208 : vector<2x32xf32>
    %238 = arith.mulf %222, %230 : vector<2x32xf32>
    %239 = arith.addf %237, %238 : vector<2x32xf32>
    %240 = math.tanh %239 : vector<2x32xf32>
    %241 = arith.mulf %236, %240 : vector<2x32xf32>
    %c6_i32 = arith.constant 6 : i32
    %242 = arith.index_cast %c6_i32 : i32 to index
    %c0_85 = arith.constant 0 : index
    %c0_86 = arith.constant 0 : index
    %243 = vector.load %arg13[%242, %c0_85, %c0_86] : memref<8x2x128xf32, #tpu.memory_space<vmem>>, vector<1x2x128xf32>
    %244 = vector.shape_cast %243 : vector<1x2x128xf32> to vector<2x128xf32>
    %c0_87 = arith.constant 0 : index
    %c0_88 = arith.constant 0 : index
    %245 = vector.load %arg6[%c0_87, %c0_88] : memref<32x128xf32, #tpu.memory_space<vmem>>, vector<32x128xf32>
    %cst_89 = arith.constant dense<0.000000e+00> : vector<2x128xf32>
    %246 = tpu.matmul %241, %245, %cst_89 {dimension_numbers = #tpu.dot_dimension_numbers<[1], [0], [0], [1], [0, 0, 1, 1], [], []>} : vector<2x32xf32>, vector<32x128xf32>, vector<2x128xf32> -> vector<2x128xf32>
    %247 = arith.addf %244, %246 : vector<2x128xf32>
    %248 = vector.extract_strided_slice %247 {offsets = [0, 0], sizes = [2, 32], strides = [1, 1]} : vector<2x128xf32> to vector<2x32xf32>
    %249 = arith.negf %248 : vector<2x32xf32>
    %250 = math.exp %249 : vector<2x32xf32>
    %cst_90 = arith.constant 1.000000e+00 : f32
    %251 = vector.broadcast %cst_90 : f32 to vector<2x32xf32>
    %252 = arith.addf %251, %250 : vector<2x32xf32>
    %253 = arith.divf %251, %252 : vector<2x32xf32>
    %254 = vector.extract_strided_slice %247 {offsets = [0, 32], sizes = [2, 32], strides = [1, 1]} : vector<2x128xf32> to vector<2x32xf32>
    %255 = arith.negf %254 : vector<2x32xf32>
    %256 = math.exp %255 : vector<2x32xf32>
    %cst_91 = arith.constant 1.000000e+00 : f32
    %257 = vector.broadcast %cst_91 : f32 to vector<2x32xf32>
    %258 = arith.addf %257, %256 : vector<2x32xf32>
    %259 = arith.divf %257, %258 : vector<2x32xf32>
    %260 = vector.extract_strided_slice %247 {offsets = [0, 64], sizes = [2, 32], strides = [1, 1]} : vector<2x128xf32> to vector<2x32xf32>
    %261 = math.tanh %260 : vector<2x32xf32>
    %262 = vector.extract_strided_slice %247 {offsets = [0, 96], sizes = [2, 32], strides = [1, 1]} : vector<2x128xf32> to vector<2x32xf32>
    %263 = arith.negf %262 : vector<2x32xf32>
    %264 = math.exp %263 : vector<2x32xf32>
    %cst_92 = arith.constant 1.000000e+00 : f32
    %265 = vector.broadcast %cst_92 : f32 to vector<2x32xf32>
    %266 = arith.addf %265, %264 : vector<2x32xf32>
    %267 = arith.divf %265, %266 : vector<2x32xf32>
    %268 = arith.mulf %259, %239 : vector<2x32xf32>
    %269 = arith.mulf %253, %261 : vector<2x32xf32>
    %270 = arith.addf %268, %269 : vector<2x32xf32>
    %271 = math.tanh %270 : vector<2x32xf32>
    %272 = arith.mulf %267, %271 : vector<2x32xf32>
    %c7_i32 = arith.constant 7 : i32
    %273 = arith.index_cast %c7_i32 : i32 to index
    %c0_93 = arith.constant 0 : index
    %c0_94 = arith.constant 0 : index
    %274 = vector.load %arg13[%273, %c0_93, %c0_94] : memref<8x2x128xf32, #tpu.memory_space<vmem>>, vector<1x2x128xf32>
    %275 = vector.shape_cast %274 : vector<1x2x128xf32> to vector<2x128xf32>
    %c0_95 = arith.constant 0 : index
    %c0_96 = arith.constant 0 : index
    %276 = vector.load %arg6[%c0_95, %c0_96] : memref<32x128xf32, #tpu.memory_space<vmem>>, vector<32x128xf32>
    %cst_97 = arith.constant dense<0.000000e+00> : vector<2x128xf32>
    %277 = tpu.matmul %272, %276, %cst_97 {dimension_numbers = #tpu.dot_dimension_numbers<[1], [0], [0], [1], [0, 0, 1, 1], [], []>} : vector<2x32xf32>, vector<32x128xf32>, vector<2x128xf32> -> vector<2x128xf32>
    %278 = arith.addf %275, %277 : vector<2x128xf32>
    %279 = vector.extract_strided_slice %278 {offsets = [0, 0], sizes = [2, 32], strides = [1, 1]} : vector<2x128xf32> to vector<2x32xf32>
    %280 = arith.negf %279 : vector<2x32xf32>
    %281 = math.exp %280 : vector<2x32xf32>
    %cst_98 = arith.constant 1.000000e+00 : f32
    %282 = vector.broadcast %cst_98 : f32 to vector<2x32xf32>
    %283 = arith.addf %282, %281 : vector<2x32xf32>
    %284 = arith.divf %282, %283 : vector<2x32xf32>
    %285 = vector.extract_strided_slice %278 {offsets = [0, 32], sizes = [2, 32], strides = [1, 1]} : vector<2x128xf32> to vector<2x32xf32>
    %286 = arith.negf %285 : vector<2x32xf32>
    %287 = math.exp %286 : vector<2x32xf32>
    %cst_99 = arith.constant 1.000000e+00 : f32
    %288 = vector.broadcast %cst_99 : f32 to vector<2x32xf32>
    %289 = arith.addf %288, %287 : vector<2x32xf32>
    %290 = arith.divf %288, %289 : vector<2x32xf32>
    %291 = vector.extract_strided_slice %278 {offsets = [0, 64], sizes = [2, 32], strides = [1, 1]} : vector<2x128xf32> to vector<2x32xf32>
    %292 = math.tanh %291 : vector<2x32xf32>
    %293 = vector.extract_strided_slice %278 {offsets = [0, 96], sizes = [2, 32], strides = [1, 1]} : vector<2x128xf32> to vector<2x32xf32>
    %294 = arith.negf %293 : vector<2x32xf32>
    %295 = math.exp %294 : vector<2x32xf32>
    %cst_100 = arith.constant 1.000000e+00 : f32
    %296 = vector.broadcast %cst_100 : f32 to vector<2x32xf32>
    %297 = arith.addf %296, %295 : vector<2x32xf32>
    %298 = arith.divf %296, %297 : vector<2x32xf32>
    %299 = arith.mulf %290, %270 : vector<2x32xf32>
    %300 = arith.mulf %284, %292 : vector<2x32xf32>
    %301 = arith.addf %299, %300 : vector<2x32xf32>
    %302 = math.tanh %301 : vector<2x32xf32>
    %303 = arith.mulf %298, %302 : vector<2x32xf32>
    %c8_i32 = arith.constant 8 : i32
    %c0_101 = arith.constant 0 : index
    %c0_102 = arith.constant 0 : index
    %304 = vector.load %arg10[%c0_101, %c0_102] : memref<32x4xf32, #tpu.memory_space<vmem>>, vector<32x4xf32>
    %cst_103 = arith.constant dense<0.000000e+00> : vector<2x4xf32>
    %305 = tpu.matmul %303, %304, %cst_103 {dimension_numbers = #tpu.dot_dimension_numbers<[1], [0], [0], [1], [0, 0, 1, 1], [], []>} : vector<2x32xf32>, vector<32x4xf32>, vector<2x4xf32> -> vector<2x4xf32>
    %c0_104 = arith.constant 0 : index
    %c0_105 = arith.constant 0 : index
    %306 = vector.load %arg11[%c0_104, %c0_105] : memref<1x4xf32, #tpu.memory_space<vmem>>, vector<1x4xf32>
    %307 = vector.broadcast %306 : vector<1x4xf32> to vector<2x4xf32>
    %308 = arith.addf %305, %307 : vector<2x4xf32>
    %c0_106 = arith.constant 0 : index
    %c0_107 = arith.constant 0 : index
    %309 = vector.load %arg12[%c0_106, %c0_107] : memref<2x4xf32, #tpu.memory_space<vmem>>, vector<2x4xf32>
    tpu.vector_store %arg12[%c0_106, %c0_107], %308 {strides = array<i32>} : memref<2x4xf32, #tpu.memory_space<vmem>>, vector<2x4xf32>,
    return
  }
  func.func @transform_0(%arg0: i32) -> (i32, i32, i32) {
    %c0_i32 = arith.constant 0 : i32
    %c0_i32_0 = arith.constant 0 : i32
    %c0_i32_1 = arith.constant 0 : i32
    %c0_i32_2 = arith.constant 0 : i32
    return %c0_i32, %c0_i32_0, %c0_i32_1 : i32, i32, i32
  }
  func.func @transform_1(%arg0: i32) -> (i32, i32) {
    %c0_i32 = arith.constant 0 : i32
    %c0_i32_0 = arith.constant 0 : i32
    %c0_i32_1 = arith.constant 0 : i32
    return %c0_i32, %c0_i32_0 : i32, i32
  }
  func.func @transform_2(%arg0: i32) -> (i32, i32) {
    %c0_i32 = arith.constant 0 : i32
    %c0_i32_0 = arith.constant 0 : i32
    %c0_i32_1 = arith.constant 0 : i32
    return %c0_i32, %c0_i32_0 : i32, i32
  }
  func.func @transform_3(%arg0: i32) -> (i32, i32) {
    %c0_i32 = arith.constant 0 : i32
    %c0_i32_0 = arith.constant 0 : i32
    %c0_i32_1 = arith.constant 0 : i32
    return %c0_i32, %c0_i32_0 : i32, i32
  }
  func.func @transform_4(%arg0: i32) -> (i32, i32) {
    %c0_i32 = arith.constant 0 : i32
    %c0_i32_0 = arith.constant 0 : i32
    %c0_i32_1 = arith.constant 0 : i32
    return %c0_i32, %c0_i32_0 : i32, i32
  }
  func.func @transform_5(%arg0: i32) -> (i32, i32) {
    %c0_i32 = arith.constant 0 : i32
    %c0_i32_0 = arith.constant 0 : i32
    %c0_i32_1 = arith.constant 0 : i32
    return %c0_i32, %c0_i32_0 : i32, i32
  }
  func.func @transform_6(%arg0: i32) -> (i32, i32) {
    %c0_i32 = arith.constant 0 : i32
    %c0_i32_0 = arith.constant 0 : i32
    %c0_i32_1 = arith.constant 0 : i32
    return %c0_i32, %c0_i32_0 : i32, i32
  }
  func.func @transform_7(%arg0: i32) -> (i32, i32) {
    %c0_i32 = arith.constant 0 : i32
    %c0_i32_0 = arith.constant 0 : i32
    %c0_i32_1 = arith.constant 0 : i32
    return %c0_i32, %c0_i32_0 : i32, i32
  }
  func.func @transform_8(%arg0: i32) -> (i32, i32) {
    %c0_i32 = arith.constant 0 : i32
    %c0_i32_0 = arith.constant 0 : i32
    %c0_i32_1 = arith.constant 0 : i32
    return %c0_i32, %c0_i32_0 : i32, i32
  }
  func.func @transform_9(%arg0: i32) -> (i32, i32) {
    %c0_i32 = arith.constant 0 : i32
    %c0_i32_0 = arith.constant 0 : i32
    %c0_i32_1 = arith.constant 0 : i32
    return %c0_i32, %c0_i32_0 : i32, i32
  }
  func.func @transform_10(%arg0: i32) -> (i32, i32) {
    %c0_i32 = arith.constant 0 : i32
    %c0_i32_0 = arith.constant 0 : i32
    %c0_i32_1 = arith.constant 0 : i32
    return %c0_i32, %c0_i32_0 : i32, i32
  }
  func.func @transform_11(%arg0: i32) -> (i32, i32) {
    %c0_i32 = arith.constant 0 : i32
    %c0_i32_0 = arith.constant 0 : i32
    %c0_i32_1 = arith.constant 0 : i32
    return %c0_i32, %c0_i32_0 : i32, i32
  }
}

</mosaic_0001>

<bundles_post_ra>
// kernel: tpu_custom_call.1
= control target key start
LH: loop header
LB: loop body
LE: loop exit
PB: predicated region body
PF: predicated region fallthrough
CT: control target
= control target key end

     0   :  { %16 = vsyncpa [#allocation4], 0  ;;  %s1251_s0 = inlined_call_operand.vmem [shape: f32[2,24,8], index: 0, kind: input, shape index: {}]   ;;  %s1252_s1 = inlined_call_operand.vmem [shape: f32[16,24], index: 1, kind: input, shape index: {}]   ;;  %s1253_s2 = inlined_call_operand.hbm [shape: f32[24,64], index: 2, kind: input, shape index: {}]   ;;  %s1254_s3 = inlined_call_operand.vmem [shape: f32[1,64], index: 3, kind: input, shape index: {}]   ;;  %s1255_s4 = inlined_call_operand.vmem [shape: f32[64,128], index: 4, kind: input, shape index: {}]   ;;  %s1256_s5 = inlined_call_operand.hbm [shape: f32[32,128], index: 5, kind: input, shape index: {}]   ;;  %s1257_s6 = inlined_call_operand.vmem [shape: f32[1,128], index: 6, kind: input, shape index: {}]   ;;  %s1258_s7 = inlined_call_operand.vmem [shape: f32[2,32], index: 7, kind: input, shape index: {}]   ;;  %s1259_s8 = inlined_call_operand.vmem [shape: f32[2,32], index: 8, kind: input, shape index: {}]   ;;  %s1260_s9 = inlined_call_operand.vmem [shape: f32[32,4], index: 9, kind: input, shape index: {}]   ;;  %s1261_s10 = inlined_call_operand.vmem [shape: f32[1,4], index: 10, kind: input, shape index: {}]   ;;  %s1262_s11 = inlined_call_operand.hbm [shape: f32[2,4], index: 11, kind: output, shape index: {}]  }
   0x1   :  { %17 = vsyncpa [#allocation7], 0 }
   0x2   :  { %18 = vsyncpa [#allocation5], 0  ;;  %s27_s19 = sshll.u32 %s1253_s2, 4  ;;  %s1007_s20 = smov [#allocation3]   ;;  %s28_s19 = int_to_ptr.hbm [resolvable:$true] %s27_s19 }
   0x3   :  { %s29_s21 = sshll.u32 %s1007_s20, 4  ;;  %s44_s24 = sshll.u32 %s1256_s5, 4  ;;  %s30_s21 = int_to_ptr.vmem [resolvable:$true] %s29_s21  ;;  %s45_s24 = int_to_ptr.hbm [resolvable:$true] %s44_s24 }
   0x4   :  { %s1008_s25 = smov 128   ;;  %s1009_s26 = smov 8  }
   0x5   :  { %35 = dma.hbm_to_vmem [thread:$0]  %s28_s19, 384, %s30_s21, [#allocation4], %s1008_s25, %s1008_s25, %s1009_s26  }
   0x6   :  { %s1010_s27 = smov [#allocation6]  }
   0x7   :  { %s46_s28 = sshll.u32 %s1010_s27, 4  ;;  %s47_s28 = int_to_ptr.vmem [resolvable:$true] %s46_s28 }
   0x8   :  { %52 = dma.hbm_to_vmem [thread:$0]  %s45_s24, 512, %s47_s28, [#allocation7], %s1008_s25, %s1008_s25, %s1009_s26  }
   0x9   :  { %1001 = dma.done.wait [#allocation4], 384  }
   0xa   :  { %1002 = vsyncadd [#allocation4], 4294966912 }
   0xb   :  { %1003 = dma.done.wait [#allocation7], 512  }
   0xc   :  { %1004 = vsyncadd [#allocation7], 4294966784  ;;  %v71_v0 = vld [vmem:[%s1251_s0] sm:$0xff]  ;;  %v72_v1 = vld [vmem:[%s1251_s0 + $0x8] sm:$0xff]  ;;  %vm83_vm0 = vcmask 64512   ;;  %vm130_vm7 = vcmask 1041409  }
   0xd   :  { %v73_v2 = vld [vmem:[%s1251_s0 + $0x10] sm:$0xff]  ;;  %v74_v3 = vld [vmem:[%s1251_s0 + $0x18] sm:$0xff]  ;;  %v75_v4 = vld [vmem:[%s1251_s0 + $0x20] sm:$0xff]  ;;  %v77_v6 = vmul.f32 %v71_v0, %v71_v0  ;;  %v78_v7 = vmul.f32 %v72_v1, %v72_v1  ;;  %vm140_vm8 = vcmask 130048   ;;  %vm149_vm9 = vcmask 1041408   ;;  %s1014_s5 = smov [#allocation8]  }
   0xe   :  { %v76_v5 = vld [vmem:[%s1251_s0 + $0x28] sm:$0xff]  ;;  %v79_v8 = vmul.f32 %v73_v2, %v73_v2  ;;  %v80_v9 = vmul.f32 %v74_v3, %v74_v3  ;;  %v81_v10 = vmul.f32 %v75_v4, %v75_v4  ;;  %s1011_s0 = smov 16   ;;  %v161_v51 = vld [vmem:[#allocation3 + $0x10] sm:$0xff]  ;;  %v160_v52 = vld [vmem:[#allocation3 + $0x8] sm:$0xff]  ;;  %vm151_vm10 = vcmask 1043456   ;;  %s816_s12 = sshll.u32 %s1014_s5, 4  ;;  %s817_s12 = int_to_ptr.vmem [resolvable:$true] %s816_s12 }
   0xf   :  { %v82_v11 = vmul.f32 %v76_v5, %v76_v5  ;;  %v84_v12 = vsel %vm83_vm0, %v77_v6, 0.0  ;;  %v85_v13 = vsel %vm83_vm0, %v78_v7, 0.0  ;;  %186 = vmatpush.msra.mxu0 %v161_v51  ;;  %v159_v53 = vld [vmem:[#allocation3] sm:$0xff]  ;;  %v205_v54 = vld [vmem:[%s1255_s4 + $0x38] sm:$0xff]  ;;  %v203_v56 = vld [vmem:[%s1255_s4 + $0x28] sm:$0xff]  ;;  %vm153_vm11 = vcmask 1045504  }
  0x10   :  { %v87_v14 = vsel %vm83_vm0, %v79_v8, 0.0  ;;  %v86_v15 = vadd.f32 %v85_v13, %v84_v12  ;;  %v95_v16 = vsel %vm83_vm0, %v80_v9, 0.0  ;;  %v96_v17 = vsel %vm83_vm0, %v81_v10, 0.0  ;;  %v204_v55 = vld [vmem:[%s1255_s4 + $0x30] sm:$0xff]  ;;  %225 = vmatpush.msra.mxu1 %v205_v54  ;;  %v202_v57 = vld [vmem:[%s1255_s4 + $0x20] sm:$0xff]  ;;  %v201_v58 = vld [vmem:[%s1255_s4 + $0x18] sm:$0xff] }
  0x11   :  { %v98_v18 = vsel %vm83_vm0, %v82_v11, 0.0  ;;  %v97_v19 = vadd.f32 %v96_v17, %v95_v16  ;;  %187 = vmatpush.msra.mxu0 %v160_v52  ;;  %v155_v3 = vld [vmem:[%s1252_s1] sm:$0xff]  ;;  %vm166_vm12 = vcmask 195584   ;;  %v156_v7 = vld [vmem:[%s1252_s1 + $0x8] sm:$0xff]  ;;  %v200_v9 = vld [vmem:[%s1255_s4 + $0x10] sm:$0xff]  ;;  %vm262_vm13 = vcmask 261120  }
  0x12   :  { %v88_v20 = vadd.f32 %v87_v14, %v86_v15  ;;  %226 = vmatpush.msra.mxu1 %v204_v55  ;;  %v199_v10 = vld [vmem:[%s1255_s4 + $0x8] sm:$0xff]  ;;  %v1136_v11 = vld [vmem:[#allocation6 + $0x18] sm:$0xff]  ;;  %v1142_v13 = vld [vmem:[#allocation6 + $0x10] sm:$0xff]  ;;  %vm210_vm14 = vcmask 523264   ;;  %s818_s15 = sshll.u32 %s1262_s11, 4  ;;  %s819_s15 = int_to_ptr.hbm [resolvable:$true] %s818_s15 }
  0x13   :  { %v99_v21 = vadd.f32 %v98_v18, %v97_v19  ;;  %188 = vmatpush.msra.mxu0 %v159_v53  ;;  %278 = vmatpush.msra.mxu2 %v1136_v11  ;;  %v198_v12 = vld [vmem:[%s1255_s4] sm:$0xff]  ;;  %v1147_v14 = vld [vmem:[#allocation6 + $0x8] sm:$0xff]  ;;  %v1152_v15 = vld [vmem:[#allocation6] sm:$0xff] }
  0x14   :  { %v89_v22 = vrot.slane %v88_v20, 4  ;;  %227 = vmatpush.msra.mxu1 %v203_v56  ;;  %346 = vmatpush.msra.mxu3 %v1136_v11  ;;  %v255_v16 = vld [vmem:[%s1258_s7] sm:$0x3] }
  0x15   :  { %v100_v23 = vrot.slane %v99_v21, 4  ;;  %538 = vmatpush.msrb.mxu0 %v1136_v11  ;;  %279 = vmatpush.msra.mxu2 %v1142_v13  ;;  %v858_v17 = vld [vmem:[%s1254_s3] ss:$0 sm:$0xff]  ;;  %s1012_s3 = smov 64  }
  0x16   :  { %v90_v24 = vadd.f32 %v89_v22, %v88_v20  ;;  %228 = vmatpush.msra.mxu1 %v202_v57  ;;  %347 = vmatpush.msra.mxu3 %v1142_v13 }
  0x17   :  { %v101_v25 = vadd.f32 %v100_v23, %v99_v21  ;;  %539 = vmatpush.msrb.mxu0 %v1142_v13  ;;  %280 = vmatpush.msra.mxu2 %v1147_v14 }
  0x18   :  { %v91_v26 = vrot.slane %v90_v24, 2  ;;  %229 = vmatpush.msra.mxu1 %v201_v58  ;;  %348 = vmatpush.msra.mxu3 %v1147_v14 }
  0x19   :  { %v102_v27 = vrot.slane %v101_v25, 2  ;;  %540 = vmatpush.msrb.mxu0 %v1147_v14  ;;  %281 = vmatpush.msra.mxu2 %v1152_v15 }
  0x1a   :  { %v92_v28 = vadd.f32 %v91_v26, %v90_v24  ;;  %230 = vmatpush.msra.mxu1 %v200_v9  ;;  %833 = vmatmul.msk.f32.vlgmr.msra.gmra.mxu2 %vm262_vm13, %v255_v16  ;;  %v859_v24 = vld [vmem:[%s1257_s6] ss:$0 sm:$0xff]  ;;  %s1013_s6 = smov 32  }
  0x1b   :  { %v103_v29 = vadd.f32 %v102_v27, %v101_v25  ;;  %349 = vmatpush.msra.mxu3 %v1152_v15  ;;  %410 = vmatpush.msrb.mxu2 %v1136_v11 }
  0x1c   :  { %v93_v30 = vrot.slane %v92_v28, 1  ;;  %231 = vmatpush.msra.mxu1 %v199_v10  ;;  %541 = vmatpush.msrb.mxu0 %v1152_v15 }
  0x1d   :  { %v104_v31 = vrot.slane %v103_v29, 1  ;;  %474 = vmatpush.msrb.mxu3 %v1136_v11  ;;  %411 = vmatpush.msrb.mxu2 %v1142_v13 }
  0x1e   :  { %v94_v32 = vadd.f32 %v93_v30, %v92_v28  ;;  %232 = vmatpush.msra.mxu1 %v198_v12 }
  0x1f   :  { %v105_v33 = vadd.f32 %v104_v31, %v103_v29  ;;  %475 = vmatpush.msrb.mxu3 %v1142_v13  ;;  %412 = vmatpush.msrb.mxu2 %v1147_v14 }
  0x20   :  { %v106_v34 = vmax.f32 %v94_v32, 1e-24 }
  0x21   :  { %v107_v35 = vmax.f32 %v105_v33, 1e-24  ;;  %476 = vmatpush.msrb.mxu3 %v1147_v14  ;;  %413 = vmatpush.msrb.mxu2 %v1152_v15  ;;  %v256_v33 = vld [vmem:[%s1259_s8] sm:$0x3] }
  0x22   :  { %861 = vrsqrt.f32 %v106_v34  ;;  %vm114_vm1 = vweird.f32 %v106_v34 }
  0x23   :  { %863 = vrsqrt.f32 %v107_v35  ;;  %vm124_vm3 = vweird.f32 %v107_v35  ;;  %477 = vmatpush.msrb.mxu3 %v1152_v15  ;;  %602 = vmatpush.msra.mxu2 %v1136_v11 }
  0x25   :  { %603 = vmatpush.msra.mxu2 %v1142_v13 }
  0x27   :  { %604 = vmatpush.msra.mxu2 %v1147_v14 }
  0x28   :  { %v862_v36 = vpop.eup %861 }
  0x29   :  { %v864_v37 = vpop.eup %863  ;;  %v109_v38 = vmul.f32 %v862_v36, %v106_v34  ;;  %vm115_vm2 = vweird.f32 %v862_v36  ;;  %605 = vmatpush.msra.mxu2 %v1152_v15 }
  0x2a   :  { %v119_v39 = vmul.f32 %v864_v37, %v107_v35  ;;  %vm125_vm4 = vweird.f32 %v864_v37  ;;  %vm116_vm5 = vmor %vm114_vm1, %vm115_vm2 }
  0x2b   :  { %v110_v40 = vmul.f32 %v862_v36, %v109_v38  ;;  %vm126_vm6 = vmor %vm124_vm3, %vm125_vm4 }
  0x2c   :  { %v120_v41 = vmul.f32 %v864_v37, %v119_v39 }
  0x2d   :  { %v111_v42 = vmul.f32 0.5, %v110_v40 }
  0x2e   :  { %v121_v43 = vmul.f32 0.5, %v120_v41 }
  0x2f   :  { %v112_v44 = vsub.f32 1.5, %v111_v42 }
  0x30   :  { %v122_v45 = vsub.f32 1.5, %v121_v43 }
  0x31   :  { %v113_v46 = vmul.f32 %v862_v36, %v112_v44 }
  0x32   :  { %v123_v47 = vmul.f32 %v864_v37, %v122_v45 }
  0x33   :  { %v117_v48 = vsel %vm116_vm5, %v862_v36, %v113_v46 }
  0x34   :  { %v127_v49 = vsel %vm126_vm6, %v864_v37, %v123_v47 }
  0x35   :  { %v131_v50 = vsel %vm130_vm7, %v127_v49, %v117_v48 }
  0x36   :  { %133 = vrot.lane.b32.xlu0 %v131_v50, %s1009_s26 }
  0x3e   :  { %136 = vrot.lane.b32.xlu0 %v131_v50, %s1011_s0 }
  0x9d   :  { %v283_v28 = vpop.f32.mrf.mxu2 }
  0xa8   :  { %v134_v59 = vpop.permute.xlu0 %133 }
  0xa9   :  { %v139_v60 = vsel %vm83_vm0, %v131_v50, %v134_v59 }
  0xb0   :  { %v137_v61 = vpop.permute.xlu0 %136 }
  0xb1   :  { %v141_v62 = vsel %vm140_vm8, %v139_v60, %v137_v61 }
  0xb2   :  { %v143_v63 = vrot.slane %v141_v62, 6  ;;  %v145_v0 = vrot.slane %v141_v62, 4  ;;  %v147_v1 = vrot.slane %v141_v62, 2 }
  0xb4   :  { %v150_v2 = vsel %vm149_vm9, %v141_v62, %v143_v63 }
  0xb5   :  { %v152_v4 = vsel %vm151_vm10, %v150_v2, %v145_v0 }
  0xb6   :  { %v154_v5 = vsel %vm153_vm11, %v152_v4, %v147_v1 }
  0xb7   :  { %v157_v6 = vmul.f32 %v155_v3, %v154_v5  ;;  %v158_v8 = vmul.f32 %v156_v7, %v154_v5 }
  0xb9   :  { %829 = vmatmul.msk.f32.vlgmr.msra.gmra.mxu0 %vm166_vm12, %v157_v6 }
  0xba   :  { %730 = vmatpush.msra.mxu0 %v1136_v11 }
  0xbc   :  { %731 = vmatpush.msra.mxu0 %v1142_v13 }
  0xbe   :  { %732 = vmatpush.msra.mxu0 %v1147_v14 }
  0xc0   :  { %733 = vmatpush.msra.mxu0 %v1152_v15 }
  0xc1   :  { %830 = vmatmul.msk.f32.gmra.mxu0 %vm166_vm12, %v158_v8 }
 0x136   :  { %v190_v18 = vpop.f32.mrf.mxu0 }
 0x137   :  { %v191_v19 = vadd.f32 %v858_v17, %v190_v18 }
 0x139   :  { %v196_v20 = vmax.f32 %v191_v19, 0.0 }
 0x13b   :  { %831 = vmatmul.msk.f32.vlgmr.msra.gmra.mxu1 %vm210_vm14, %v196_v20 }
 0x13e   :  { %v193_v21 = vpop.f32.mrf.mxu0 }
 0x13f   :  { %v194_v22 = vadd.f32 %v858_v17, %v193_v21 }
 0x141   :  { %v197_v23 = vmax.f32 %v194_v22, 0.0 }
 0x143   :  { %832 = vmatmul.msk.f32.gmra.mxu1 %vm210_vm14, %v197_v23 }
 0x1b8   :  { %v234_v25 = vpop.f32.mrf.mxu1 }
 0x1b9   :  { %v235_v26 = vadd.f32 %v859_v24, %v234_v25 }
 0x1bb   :  { %240 = vst [vmem:[#allocation2] sm:$0xf] %v235_v26  }
 0x1bc   :  { %244 = vst [vmem:[#allocation2] sm:$0xf0] %v235_v26  }
 0x1c0   :  { %v237_v27 = vpop.f32.mrf.mxu1 }
 0x1c1   :  { %v238_v29 = vadd.f32 %v859_v24, %v237_v27 }
 0x1c2   :  { %v257_v30 = vld [vmem:[#allocation2] sm:$0x3]  ;;  %v328_v57 = vld [vmem:[#allocation2 + $0x2] sm:$0x3] }
 0x1c3   :  { %248 = vst [vmem:[#allocation2 + $0x8] sm:$0xf] %v238_v29   ;;  %v286_v31 = vadd.f32 %v283_v28, %v257_v30  ;;  %v392_v19 = vld [vmem:[#allocation2 + $0x4] sm:$0x3] }
 0x1c4   :  { %252 = vst [vmem:[#allocation2 + $0x8] sm:$0xf0] %v238_v29  }
 0x1c5   :  { %865 = vtanh.f32 %v286_v31  ;;  %v834_v34 = vmul.f32 -1.442695, %v286_v31 }
 0x1c7   :  { %867 = vpow2.f32 %v834_v34 }
 0x1cb   :  { %v866_v32 = vpop.eup %865 }
 0x1cc   :  { %313 = vrot.lane.b32.xlu1 %v866_v32, %s1012_s3 }
 0x1cd   :  { %v868_v35 = vpop.eup %867 }
 0x1ce   :  { %v290_v36 = vadd.f32 1.0, %v868_v35 }
 0x1d0   :  { %869 = vrcp.f32 %v290_v36  ;;  %v302_v42 = vand.u32 2147483648, %v290_v36  ;;  %vm296_vm0 = vweird.f32 %v290_v36  ;;  %v300_v43 = vand.u32 2147483647, %v290_v36 }
 0x1d2   :  { %v303_v45 = vor.u32 1.1754944e-38, %v302_v42  ;;  %vm301_vm2 = vcmp.eq.f32.partialorder %v300_v43, 8.507059e+37 }
 0x1d4   :  { %308 = vrot.lane.b32.xlu1 %v256_v33, %s1013_s6 }
 0x1d6   :  { %v870_v37 = vpop.eup %869 }
 0x1d7   :  { %v292_v38 = vmul.f32 %v870_v37, %v290_v36  ;;  %vm297_vm15 = vweird.f32 %v870_v37 }
 0x1d8   :  { %vm298_vm1 = vmor %vm296_vm0, %vm297_vm15 }
 0x1d9   :  { %v293_v39 = vsub.f32 1.0, %v292_v38 }
 0x1db   :  { %v294_v40 = vmul.f32 %v870_v37, %v293_v39 }
 0x1dd   :  { %v295_v41 = vadd.f32 %v870_v37, %v294_v40 }
 0x1df   :  { %v299_v44 = vsel %vm298_vm1, %v870_v37, %v295_v41 }
 0x1e0   :  { %v304_v47 = vsel %vm301_vm2, %v303_v45, %v299_v44  ;;  %v456_v45 = vld [vmem:[#allocation2 + $0x6] sm:$0x3] }
 0x23e   :  { %v314_v46 = vpop.permute.xlu1 %313 }
 0x23f   :  { %v316_v48 = vmul.f32 %v314_v46, %v304_v47 }
 0x241   :  { %318 = vrot.lane.b32.xlu2 %v316_v48, %s1013_s6 }
 0x246   :  { %v309_v49 = vpop.permute.xlu1 %308 }
 0x247   :  { %v311_v50 = vmul.f32 %v309_v49, %v304_v47 }
 0x29b   :  { %v319_v51 = vpop.permute.xlu2 %318 }
 0x29c   :  { %v321_v52 = vadd.f32 %v319_v51, %v311_v50 }
 0x29e   :  { %871 = vtanh.f32 %v321_v52 }
 0x2a4   :  { %v872_v53 = vpop.eup %871 }
 0x2a5   :  { %324 = vrot.lane.b32.xlu2 %v872_v53, %s1012_s3 }
 0x2ff   :  { %v325_v54 = vpop.permute.xlu2 %324 }
 0x300   :  { %v327_v55 = vmul.f32 %v325_v54, %v304_v47 }
 0x302   :  { %330 = vrot.lane.b32.xlu0 %v327_v55, %s1013_s6 }
 0x374   :  { %v331_v56 = vpop.permute.xlu0 %330 }
 0x375   :  { %835 = vmatmul.msk.f32.vlgmr.msra.gmra.mxu3 %vm262_vm13, %v331_v56 }
 0x376   :  { %666 = vmatpush.msra.mxu3 %v1136_v11 }
 0x378   :  { %667 = vmatpush.msra.mxu3 %v1142_v13 }
 0x37a   :  { %668 = vmatpush.msra.mxu3 %v1147_v14 }
 0x37c   :  { %669 = vmatpush.msra.mxu3 %v1152_v15 }
 0x3f8   :  { %v351_v58 = vpop.f32.mrf.mxu3 }
 0x3f9   :  { %v354_v59 = vadd.f32 %v351_v58, %v328_v57 }
 0x3fb   :  { %873 = vtanh.f32 %v354_v59  ;;  %v836_v61 = vmul.f32 -1.442695, %v354_v59 }
 0x3fd   :  { %875 = vpow2.f32 %v836_v61 }
 0x401   :  { %v874_v60 = vpop.eup %873 }
 0x402   :  { %377 = vrot.lane.b32.xlu1 %v874_v60, %s1012_s3 }
 0x403   :  { %v876_v62 = vpop.eup %875 }
 0x404   :  { %v358_v63 = vadd.f32 1.0, %v876_v62 }
 0x406   :  { %877 = vrcp.f32 %v358_v63  ;;  %v370_v5 = vand.u32 2147483648, %v358_v63  ;;  %vm364_vm4 = vweird.f32 %v358_v63  ;;  %v368_v6 = vand.u32 2147483647, %v358_v63 }
 0x408   :  { %v371_v8 = vor.u32 1.1754944e-38, %v370_v5  ;;  %vm369_vm6 = vcmp.eq.f32.partialorder %v368_v6, 8.507059e+37 }
 0x40c   :  { %v878_v0 = vpop.eup %877 }
 0x40d   :  { %v360_v1 = vmul.f32 %v878_v0, %v358_v63  ;;  %vm365_vm3 = vweird.f32 %v878_v0 }
 0x40e   :  { %vm366_vm5 = vmor %vm364_vm4, %vm365_vm3 }
 0x40f   :  { %v361_v2 = vsub.f32 1.0, %v360_v1 }
 0x411   :  { %v362_v3 = vmul.f32 %v878_v0, %v361_v2 }
 0x413   :  { %v363_v4 = vadd.f32 %v878_v0, %v362_v3 }
 0x415   :  { %v367_v7 = vsel %vm366_vm5, %v878_v0, %v363_v4 }
 0x416   :  { %v372_v10 = vsel %vm369_vm6, %v371_v8, %v367_v7  ;;  %v520_v7 = vld [vmem:[#allocation2 + $0x8] sm:$0x3] }
 0x417   :  { %v375_v12 = vmul.f32 %v372_v10, %v321_v52 }
 0x474   :  { %v378_v9 = vpop.permute.xlu1 %377 }
 0x475   :  { %v380_v11 = vmul.f32 %v378_v9, %v372_v10 }
 0x477   :  { %382 = vrot.lane.b32.xlu2 %v380_v11, %s1013_s6 }
 0x4d1   :  { %v383_v13 = vpop.permute.xlu2 %382 }
 0x4d2   :  { %v385_v14 = vadd.f32 %v383_v13, %v375_v12 }
 0x4d4   :  { %879 = vtanh.f32 %v385_v14 }
 0x4da   :  { %v880_v15 = vpop.eup %879 }
 0x4db   :  { %388 = vrot.lane.b32.xlu0 %v880_v15, %s1012_s3 }
 0x54d   :  { %v389_v16 = vpop.permute.xlu0 %388 }
 0x54e   :  { %v391_v17 = vmul.f32 %v389_v16, %v372_v10 }
 0x550   :  { %394 = vrot.lane.b32.xlu1 %v391_v17, %s1013_s6 }
 0x5c2   :  { %v395_v18 = vpop.permute.xlu1 %394 }
 0x5c3   :  { %837 = vmatmul.msk.f32.vlgmr.msrb.gmra.mxu2 %vm262_vm13, %v395_v18 }
 0x646   :  { %v415_v20 = vpop.f32.mrf.mxu2 }
 0x647   :  { %v418_v21 = vadd.f32 %v415_v20, %v392_v19 }
 0x649   :  { %881 = vtanh.f32 %v418_v21  ;;  %v838_v23 = vmul.f32 -1.442695, %v418_v21 }
 0x64b   :  { %883 = vpow2.f32 %v838_v23 }
 0x64f   :  { %v882_v22 = vpop.eup %881 }
 0x650   :  { %441 = vrot.lane.b32.xlu2 %v882_v22, %s1012_s3 }
 0x651   :  { %v884_v24 = vpop.eup %883 }
 0x652   :  { %v422_v25 = vadd.f32 1.0, %v884_v24 }
 0x654   :  { %885 = vrcp.f32 %v422_v25  ;;  %v434_v31 = vand.u32 2147483648, %v422_v25  ;;  %vm428_vm8 = vweird.f32 %v422_v25  ;;  %v432_v32 = vand.u32 2147483647, %v422_v25 }
 0x656   :  { %v435_v34 = vor.u32 1.1754944e-38, %v434_v31  ;;  %vm433_vm10 = vcmp.eq.f32.partialorder %v432_v32, 8.507059e+37 }
 0x65a   :  { %v886_v26 = vpop.eup %885 }
 0x65b   :  { %v424_v27 = vmul.f32 %v886_v26, %v422_v25  ;;  %vm429_vm7 = vweird.f32 %v886_v26 }
 0x65c   :  { %vm430_vm9 = vmor %vm428_vm8, %vm429_vm7 }
 0x65d   :  { %v425_v28 = vsub.f32 1.0, %v424_v27 }
 0x65f   :  { %v426_v29 = vmul.f32 %v886_v26, %v425_v28 }
 0x661   :  { %v427_v30 = vadd.f32 %v886_v26, %v426_v29 }
 0x663   :  { %v431_v33 = vsel %vm430_vm9, %v886_v26, %v427_v30 }
 0x664   :  { %v436_v36 = vsel %vm433_vm10, %v435_v34, %v431_v33  ;;  %v584_v33 = vld [vmem:[#allocation2 + $0xa] sm:$0x3] }
 0x665   :  { %v439_v38 = vmul.f32 %v436_v36, %v385_v14 }
 0x6aa   :  { %v442_v35 = vpop.permute.xlu2 %441 }
 0x6ab   :  { %v444_v37 = vmul.f32 %v442_v35, %v436_v36 }
 0x6ad   :  { %446 = vrot.lane.b32.xlu0 %v444_v37, %s1013_s6 }
 0x71f   :  { %v447_v39 = vpop.permute.xlu0 %446 }
 0x720   :  { %v449_v40 = vadd.f32 %v447_v39, %v439_v38 }
 0x722   :  { %887 = vtanh.f32 %v449_v40 }
 0x728   :  { %v888_v41 = vpop.eup %887 }
 0x729   :  { %452 = vrot.lane.b32.xlu1 %v888_v41, %s1012_s3 }
 0x79b   :  { %v453_v42 = vpop.permute.xlu1 %452 }
 0x79c   :  { %v455_v43 = vmul.f32 %v453_v42, %v436_v36 }
 0x79e   :  { %458 = vrot.lane.b32.xlu2 %v455_v43, %s1013_s6 }
 0x7f8   :  { %v459_v44 = vpop.permute.xlu2 %458 }
 0x7f9   :  { %839 = vmatmul.msk.f32.vlgmr.msrb.gmra.mxu3 %vm262_vm13, %v459_v44 }
 0x87c   :  { %v479_v46 = vpop.f32.mrf.mxu3 }
 0x87d   :  { %v482_v47 = vadd.f32 %v479_v46, %v456_v45 }
 0x87f   :  { %889 = vtanh.f32 %v482_v47  ;;  %v840_v49 = vmul.f32 -1.442695, %v482_v47 }
 0x881   :  { %891 = vpow2.f32 %v840_v49 }
 0x885   :  { %v890_v48 = vpop.eup %889 }
 0x886   :  { %505 = vrot.lane.b32.xlu0 %v890_v48, %s1012_s3 }
 0x887   :  { %v892_v50 = vpop.eup %891 }
 0x888   :  { %v486_v51 = vadd.f32 1.0, %v892_v50 }
 0x88a   :  { %893 = vrcp.f32 %v486_v51  ;;  %v498_v57 = vand.u32 2147483648, %v486_v51  ;;  %vm492_vm12 = vweird.f32 %v486_v51  ;;  %v496_v58 = vand.u32 2147483647, %v486_v51 }
 0x88c   :  { %v499_v60 = vor.u32 1.1754944e-38, %v498_v57  ;;  %vm497_vm15 = vcmp.eq.f32.partialorder %v496_v58, 8.507059e+37 }
 0x890   :  { %v894_v52 = vpop.eup %893 }
 0x891   :  { %v488_v53 = vmul.f32 %v894_v52, %v486_v51  ;;  %vm493_vm11 = vweird.f32 %v894_v52 }
 0x892   :  { %vm494_vm14 = vmor %vm492_vm12, %vm493_vm11 }
 0x893   :  { %v489_v54 = vsub.f32 1.0, %v488_v53 }
 0x895   :  { %v490_v55 = vmul.f32 %v894_v52, %v489_v54 }
 0x897   :  { %v491_v56 = vadd.f32 %v894_v52, %v490_v55 }
 0x899   :  { %v495_v59 = vsel %vm494_vm14, %v894_v52, %v491_v56 }
 0x89a   :  { %v500_v62 = vsel %vm497_vm15, %v499_v60, %v495_v59  ;;  %v648_v59 = vld [vmem:[#allocation2 + $0xc] sm:$0x3] }
 0x89b   :  { %v503_v0 = vmul.f32 %v500_v62, %v449_v40 }
 0x8f8   :  { %v506_v61 = vpop.permute.xlu0 %505 }
 0x8f9   :  { %v508_v63 = vmul.f32 %v506_v61, %v500_v62 }
 0x8fb   :  { %510 = vrot.lane.b32.xlu1 %v508_v63, %s1013_s6 }
 0x96d   :  { %v511_v1 = vpop.permute.xlu1 %510 }
 0x96e   :  { %v513_v2 = vadd.f32 %v511_v1, %v503_v0 }
 0x970   :  { %895 = vtanh.f32 %v513_v2 }
 0x976   :  { %v896_v3 = vpop.eup %895 }
 0x977   :  { %516 = vrot.lane.b32.xlu2 %v896_v3, %s1012_s3 }
 0x9d1   :  { %v517_v4 = vpop.permute.xlu2 %516 }
 0x9d2   :  { %v519_v5 = vmul.f32 %v517_v4, %v500_v62 }
 0x9d4   :  { %522 = vrot.lane.b32.xlu0 %v519_v5, %s1013_s6 }
 0xa46   :  { %v523_v6 = vpop.permute.xlu0 %522 }
 0xa47   :  { %841 = vmatmul.msk.f32.vlgmr.msrb.gmra.mxu0 %vm262_vm13, %v523_v6 }
 0xac4   :  { %v543_v8 = vpop.f32.mrf.mxu0 }
 0xac5   :  { %v546_v9 = vadd.f32 %v543_v8, %v520_v7 }
 0xac7   :  { %897 = vtanh.f32 %v546_v9  ;;  %v842_v11 = vmul.f32 -1.442695, %v546_v9 }
 0xac9   :  { %899 = vpow2.f32 %v842_v11 }
 0xacd   :  { %v898_v10 = vpop.eup %897 }
 0xace   :  { %569 = vrot.lane.b32.xlu1 %v898_v10, %s1012_s3 }
 0xacf   :  { %v900_v12 = vpop.eup %899 }
 0xad0   :  { %v550_v13 = vadd.f32 1.0, %v900_v12 }
 0xad2   :  { %901 = vrcp.f32 %v550_v13  ;;  %v562_v19 = vand.u32 2147483648, %v550_v13  ;;  %vm556_vm1 = vweird.f32 %v550_v13  ;;  %v560_v20 = vand.u32 2147483647, %v550_v13 }
 0xad4   :  { %v563_v22 = vor.u32 1.1754944e-38, %v562_v19  ;;  %vm561_vm3 = vcmp.eq.f32.partialorder %v560_v20, 8.507059e+37 }
 0xad8   :  { %v902_v14 = vpop.eup %901 }
 0xad9   :  { %v552_v15 = vmul.f32 %v902_v14, %v550_v13  ;;  %vm557_vm0 = vweird.f32 %v902_v14 }
 0xada   :  { %vm558_vm2 = vmor %vm556_vm1, %vm557_vm0  ;;  %vm809_vm1 = vcmask 25600  }
 0xadb   :  { %v553_v16 = vsub.f32 1.0, %v552_v15 }
 0xadd   :  { %v554_v17 = vmul.f32 %v902_v14, %v553_v16 }
 0xadf   :  { %v555_v18 = vadd.f32 %v902_v14, %v554_v17 }
 0xae1   :  { %v559_v21 = vsel %vm558_vm2, %v902_v14, %v555_v18 }
 0xae2   :  { %v564_v24 = vsel %vm561_vm3, %v563_v22, %v559_v21  ;;  %v712_v21 = vld [vmem:[#allocation2 + $0xe] sm:$0x3] }
 0xae3   :  { %v567_v26 = vmul.f32 %v564_v24, %v513_v2 }
 0xb40   :  { %v570_v23 = vpop.permute.xlu1 %569 }
 0xb41   :  { %v572_v25 = vmul.f32 %v570_v23, %v564_v24 }
 0xb43   :  { %574 = vrot.lane.b32.xlu2 %v572_v25, %s1013_s6 }
 0xb9d   :  { %v575_v27 = vpop.permute.xlu2 %574 }
 0xb9e   :  { %v577_v28 = vadd.f32 %v575_v27, %v567_v26 }
 0xba0   :  { %903 = vtanh.f32 %v577_v28 }
 0xba6   :  { %v904_v29 = vpop.eup %903 }
 0xba7   :  { %580 = vrot.lane.b32.xlu0 %v904_v29, %s1012_s3 }
 0xc19   :  { %v581_v30 = vpop.permute.xlu0 %580 }
 0xc1a   :  { %v583_v31 = vmul.f32 %v581_v30, %v564_v24 }
 0xc1c   :  { %586 = vrot.lane.b32.xlu1 %v583_v31, %s1013_s6 }
 0xc8e   :  { %v587_v32 = vpop.permute.xlu1 %586 }
 0xc8f   :  { %843 = vmatmul.msk.f32.vlgmr.msra.gmra.mxu2 %vm262_vm13, %v587_v32 }
 0xd12   :  { %v607_v34 = vpop.f32.mrf.mxu2 }
 0xd13   :  { %v610_v35 = vadd.f32 %v607_v34, %v584_v33 }
 0xd15   :  { %905 = vtanh.f32 %v610_v35  ;;  %v844_v37 = vmul.f32 -1.442695, %v610_v35 }
 0xd17   :  { %907 = vpow2.f32 %v844_v37 }
 0xd1b   :  { %v906_v36 = vpop.eup %905 }
 0xd1c   :  { %633 = vrot.lane.b32.xlu2 %v906_v36, %s1012_s3 }
 0xd1d   :  { %v908_v38 = vpop.eup %907 }
 0xd1e   :  { %v614_v39 = vadd.f32 1.0, %v908_v38 }
 0xd20   :  { %909 = vrcp.f32 %v614_v39  ;;  %v626_v45 = vand.u32 2147483648, %v614_v39  ;;  %vm620_vm5 = vweird.f32 %v614_v39  ;;  %v624_v46 = vand.u32 2147483647, %v614_v39 }
 0xd22   :  { %v627_v48 = vor.u32 1.1754944e-38, %v626_v45  ;;  %vm625_vm7 = vcmp.eq.f32.partialorder %v624_v46, 8.507059e+37  ;;  %v778_v45 = vld [vmem:[%s1260_s9 + $0x10] sm:$0xff]  ;;  %v777_v46 = vld [vmem:[%s1260_s9 + $0x8] sm:$0xff] }
 0xd26   :  { %v910_v40 = vpop.eup %909 }
 0xd27   :  { %v616_v41 = vmul.f32 %v910_v40, %v614_v39  ;;  %vm621_vm4 = vweird.f32 %v910_v40 }
 0xd28   :  { %vm622_vm6 = vmor %vm620_vm5, %vm621_vm4 }
 0xd29   :  { %v617_v42 = vsub.f32 1.0, %v616_v41 }
 0xd2b   :  { %v618_v43 = vmul.f32 %v910_v40, %v617_v42 }
 0xd2d   :  { %v619_v44 = vadd.f32 %v910_v40, %v618_v43 }
 0xd2f   :  { %v623_v47 = vsel %vm622_vm6, %v910_v40, %v619_v44  ;;  %v779_v44 = vld [vmem:[%s1260_s9 + $0x18] sm:$0xff] }
 0xd30   :  { %v628_v50 = vsel %vm625_vm7, %v627_v48, %v623_v47  ;;  %801 = vmatpush.msrb.mxu1 %v779_v44  ;;  %v776_v47 = vld [vmem:[%s1260_s9] sm:$0xff] }
 0xd31   :  { %v631_v52 = vmul.f32 %v628_v50, %v577_v28 }
 0xd32   :  { %802 = vmatpush.msrb.mxu1 %v778_v45 }
 0xd34   :  { %803 = vmatpush.msrb.mxu1 %v777_v46 }
 0xd36   :  { %804 = vmatpush.msrb.mxu1 %v776_v47 }
 0xd76   :  { %v634_v49 = vpop.permute.xlu2 %633 }
 0xd77   :  { %v636_v51 = vmul.f32 %v634_v49, %v628_v50 }
 0xd79   :  { %638 = vrot.lane.b32.xlu0 %v636_v51, %s1013_s6  ;;  %v860_v51 = vld [vmem:[%s1261_s10] ss:$0 sm:$0xff] }
 0xdeb   :  { %v639_v53 = vpop.permute.xlu0 %638 }
 0xdec   :  { %v641_v54 = vadd.f32 %v639_v53, %v631_v52 }
 0xdee   :  { %911 = vtanh.f32 %v641_v54 }
 0xdf4   :  { %v912_v55 = vpop.eup %911 }
 0xdf5   :  { %644 = vrot.lane.b32.xlu1 %v912_v55, %s1012_s3 }
 0xe67   :  { %v645_v56 = vpop.permute.xlu1 %644 }
 0xe68   :  { %v647_v57 = vmul.f32 %v645_v56, %v628_v50 }
 0xe6a   :  { %650 = vrot.lane.b32.xlu2 %v647_v57, %s1013_s6 }
 0xec4   :  { %v651_v58 = vpop.permute.xlu2 %650 }
 0xec5   :  { %845 = vmatmul.msk.f32.vlgmr.msra.gmra.mxu3 %vm262_vm13, %v651_v58 }
 0xf48   :  { %v671_v60 = vpop.f32.mrf.mxu3 }
 0xf49   :  { %v674_v61 = vadd.f32 %v671_v60, %v648_v59 }
 0xf4b   :  { %913 = vtanh.f32 %v674_v61  ;;  %v846_v63 = vmul.f32 -1.442695, %v674_v61 }
 0xf4d   :  { %915 = vpow2.f32 %v846_v63 }
 0xf51   :  { %v914_v62 = vpop.eup %913 }
 0xf52   :  { %697 = vrot.lane.b32.xlu0 %v914_v62, %s1012_s3 }
 0xf53   :  { %v916_v0 = vpop.eup %915 }
 0xf54   :  { %v678_v1 = vadd.f32 1.0, %v916_v0 }
 0xf56   :  { %917 = vrcp.f32 %v678_v1  ;;  %v690_v7 = vand.u32 2147483648, %v678_v1  ;;  %vm684_vm9 = vweird.f32 %v678_v1  ;;  %v688_v8 = vand.u32 2147483647, %v678_v1 }
 0xf58   :  { %v691_v10 = vor.u32 1.1754944e-38, %v690_v7  ;;  %vm689_vm11 = vcmp.eq.f32.partialorder %v688_v8, 8.507059e+37 }
 0xf5c   :  { %v918_v2 = vpop.eup %917 }
 0xf5d   :  { %v680_v3 = vmul.f32 %v918_v2, %v678_v1  ;;  %vm685_vm8 = vweird.f32 %v918_v2 }
 0xf5e   :  { %vm686_vm10 = vmor %vm684_vm9, %vm685_vm8 }
 0xf5f   :  { %v681_v4 = vsub.f32 1.0, %v680_v3 }
 0xf61   :  { %v682_v5 = vmul.f32 %v918_v2, %v681_v4 }
 0xf63   :  { %v683_v6 = vadd.f32 %v918_v2, %v682_v5 }
 0xf65   :  { %v687_v9 = vsel %vm686_vm10, %v918_v2, %v683_v6 }
 0xf66   :  { %v692_v12 = vsel %vm689_vm11, %v691_v10, %v687_v9 }
 0xf67   :  { %v695_v14 = vmul.f32 %v692_v12, %v641_v54 }
 0xfc4   :  { %v698_v11 = vpop.permute.xlu0 %697 }
 0xfc5   :  { %v700_v13 = vmul.f32 %v698_v11, %v692_v12 }
 0xfc7   :  { %702 = vrot.lane.b32.xlu1 %v700_v13, %s1013_s6 }
0x1039   :  { %v703_v15 = vpop.permute.xlu1 %702 }
0x103a   :  { %v705_v16 = vadd.f32 %v703_v15, %v695_v14 }
0x103c   :  { %919 = vtanh.f32 %v705_v16 }
0x1042   :  { %v920_v17 = vpop.eup %919 }
0x1043   :  { %708 = vrot.lane.b32.xlu2 %v920_v17, %s1012_s3 }
0x109d   :  { %v709_v18 = vpop.permute.xlu2 %708 }
0x109e   :  { %v711_v19 = vmul.f32 %v709_v18, %v692_v12 }
0x10a0   :  { %714 = vrot.lane.b32.xlu0 %v711_v19, %s1013_s6 }
0x1112   :  { %v715_v20 = vpop.permute.xlu0 %714 }
0x1113   :  { %847 = vmatmul.msk.f32.vlgmr.msra.gmra.mxu0 %vm262_vm13, %v715_v20 }
0x1190   :  { %v735_v22 = vpop.f32.mrf.mxu0 }
0x1191   :  { %v738_v23 = vadd.f32 %v735_v22, %v712_v21 }
0x1193   :  { %921 = vtanh.f32 %v738_v23  ;;  %v848_v25 = vmul.f32 -1.442695, %v738_v23 }
0x1195   :  { %923 = vpow2.f32 %v848_v25 }
0x1199   :  { %v922_v24 = vpop.eup %921 }
0x119a   :  { %761 = vrot.lane.b32.xlu1 %v922_v24, %s1012_s3 }
0x119b   :  { %v924_v26 = vpop.eup %923 }
0x119c   :  { %v742_v27 = vadd.f32 1.0, %v924_v26 }
0x119e   :  { %925 = vrcp.f32 %v742_v27  ;;  %v754_v33 = vand.u32 2147483648, %v742_v27  ;;  %vm748_vm14 = vweird.f32 %v742_v27  ;;  %v752_v34 = vand.u32 2147483647, %v742_v27 }
0x11a0   :  { %v755_v36 = vor.u32 1.1754944e-38, %v754_v33  ;;  %vm753_vm0 = vcmp.eq.f32.partialorder %v752_v34, 8.507059e+37 }
0x11a4   :  { %v926_v28 = vpop.eup %925 }
0x11a5   :  { %v744_v29 = vmul.f32 %v926_v28, %v742_v27  ;;  %vm749_vm12 = vweird.f32 %v926_v28 }
0x11a6   :  { %vm750_vm15 = vmor %vm748_vm14, %vm749_vm12 }
0x11a7   :  { %v745_v30 = vsub.f32 1.0, %v744_v29 }
0x11a9   :  { %v746_v31 = vmul.f32 %v926_v28, %v745_v30 }
0x11ab   :  { %v747_v32 = vadd.f32 %v926_v28, %v746_v31 }
0x11ad   :  { %v751_v35 = vsel %vm750_vm15, %v926_v28, %v747_v32 }
0x11ae   :  { %v756_v38 = vsel %vm753_vm0, %v755_v36, %v751_v35 }
0x11af   :  { %v759_v40 = vmul.f32 %v756_v38, %v705_v16 }
0x120c   :  { %v762_v37 = vpop.permute.xlu1 %761 }
0x120d   :  { %v764_v39 = vmul.f32 %v762_v37, %v756_v38 }
0x120f   :  { %766 = vrot.lane.b32.xlu2 %v764_v39, %s1013_s6 }
0x1269   :  { %v767_v41 = vpop.permute.xlu2 %766 }
0x126a   :  { %v769_v42 = vadd.f32 %v767_v41, %v759_v40 }
0x126c   :  { %927 = vtanh.f32 %v769_v42 }
0x1272   :  { %v928_v43 = vpop.eup %927 }
0x1273   :  { %772 = vrot.lane.b32.xlu0 %v928_v43, %s1012_s3 }
0x12e5   :  { %v773_v48 = vpop.permute.xlu0 %772 }
0x12e6   :  { %v775_v49 = vmul.f32 %v773_v48, %v756_v38 }
0x12e8   :  { %785 = vrot.lane.b32.xlu1 %v775_v49, %s1013_s6 }
0x135a   :  { %v786_v50 = vpop.permute.xlu1 %785 }
0x135b   :  { %849 = vmatmul.msk.f32.vlgmr.msrb.gmra.mxu1 %vm262_vm13, %v786_v50 }
0x13d8   :  { %v806_v52 = vpop.f32.mrf.mxu1 }
0x13d9   :  { %v807_v53 = vadd.f32 %v860_v51, %v806_v52 }
0x13db   :  { %810 = vst.msk [vmem:[#allocation8] sm:$0x3] %vm809_vm1, %v807_v53 }
0x13dc   :  { %821 = dma.vmem_to_hbm [thread:$0]  %s817_s12, 32, %s819_s15, [#allocation5]  }
0x13dd   :  { %1005 = dma.done.wait [#allocation5], 32  }
0x13de   :  { %1006 = vsyncadd [#allocation5], 4294967264 }
0x13df   :  { %826 = vsyncpa [#allocation4], 1 }
0x13e0   :  { %827 = vsyncpa [#allocation7], 1 }
0x13e1   :  { %828 = vsyncpa [#allocation5], 1 }

</bundles_post_ra>
